<compile_context>
chip_gen: v6e
topology: v6e:2x2x1
jax: 0.10.0
libtpu: 0.0.40
codegen_flags: <defaults>
</compile_context>

<pallas_src>
import functools
import numpy as np

import jax
import jax.numpy as jnp
from jax.experimental import pallas as pl
from jax.experimental.pallas import tpu as pltpu

F32 = jnp.float32
EPS = 1e-5


# ----------------------------- in-kernel helpers -----------------------------

def _layer_norm(v, gamma, beta):
    m = jnp.mean(v, axis=-1, keepdims=True)
    var = jnp.mean((v - m) ** 2, axis=-1, keepdims=True)
    return (v - m) * jax.lax.rsqrt(var + EPS) * gamma + beta


def _source2token_pool(x, mask, w1, b1, gamma, beta, w2row):
    """Shared Source2Token layer pooled over one-hot groups.

    x: (R, H) flattened node features, mask: (G, R) block-diagonal one-hot
    group indicator.  Returns (G, H) softmax-attention-weighted sums.
    """
    h = jnp.dot(x, w1, preferred_element_type=F32) + b1          # (R, 4H)
    h = jnp.tanh(_layer_norm(h, gamma, beta))
    s = jnp.sum(h * w2row, axis=-1, keepdims=True)               # (R, 1) logits
    # fc2 bias is a constant shift of every logit -> softmax-invariant (exact).
    # Global-max shift for numerical stability (also softmax-invariant).
    s = s - jnp.max(s, axis=0, keepdims=True)
    expd = jnp.exp(s)                                            # (R, 1)
    num = jnp.dot(mask, expd * x, preferred_element_type=F32)    # (G, H)
    den = jnp.dot(mask, expd, preferred_element_type=F32)        # (G, 1)
    return num * pl.reciprocal(jnp.maximum(den, 1e-20), approx=True)


# ------------------------------- fused kernel --------------------------------

def _mlkg_fused_kernel(B, N1, N2, N3, H, ind13,
                       x_ref, adj1_ref, adj2m_ref, m21_ref, m32_ref,
                       vec32_ref, vecl_ref, vec128_ref,
                       gcn2w_ref, gatw_ref, s2t12w1_ref, s2t23w1_ref,
                       mlpw1_ref, mlpw2_ref, b3_ref, o_ref):
    v32 = vec32_ref[...]      # (12, H)   packed per-feature parameter rows
    vl = vecl_ref[...]        # (8, 4H)   packed Source2Token parameter rows
    v128 = vec128_ref[...]    # (7, 128)  packed MLP-head parameter rows

    def r32(i):
        return v32[i:i + 1, :]

    def rl(i):
        return vl[i:i + 1, :]

    def r128(i):
        return v128[i:i + 1, :]

    adj1 = adj1_ref[...]      # (B*N1, B*N1) block-diag D^-1/2 (A+I) D^-1/2

    # --- ConvBlock_v1 #1: GCN(1 -> H) + LayerNorm  (Fin=1 -> VPU outer prod) --
    xw = x_ref[...] * r32(0)                                    # (B*N1, H)
    agg = jnp.dot(adj1, xw, preferred_element_type=F32) + r32(1)
    lv1 = _layer_norm(agg, r32(2), r32(3))

    # --- ConvBlock_v1 #2: GCN(H -> H) + LayerNorm, residual ---
    xw2 = jnp.dot(lv1, gcn2w_ref[...], preferred_element_type=F32)
    agg2 = jnp.dot(adj1, xw2, preferred_element_type=F32) + r32(4)
    lv1 = lv1 + _layer_norm(agg2, r32(5), r32(6))

    # --- InterPropagation Source2Token: level 1 -> level 2 ---
    lv2 = _source2token_pool(lv1, m21_ref[...], s2t12w1_ref[...],
                             rl(0), rl(1), rl(2), rl(3))         # (B*N2, H)

    # --- ConvBlock_v2: GAT(H -> H, heads=1) + LayerNorm ---
    lv2_3 = lv2.reshape(B, N2, H)
    xw3 = jnp.einsum('bnh,hk->bnk', lv2_3, gatw_ref[...],
                     preferred_element_type=F32)
    a_s = jnp.sum(xw3 * r32(8), axis=-1)                         # (B, N2) source
    a_d = jnp.sum(xw3 * r32(9), axis=-1)                         # (B, N2) target
    e = a_d[:, :, None] + a_s[:, None, :]                        # e[b,i,j]: j -> i
    e = jnp.where(e > 0, e, 0.2 * e)                             # LeakyReLU(0.2)
    e = jnp.where(adj2m_ref[...][None, :, :] > 0, e, -1e30)
    p = jnp.exp(e - jnp.max(e, axis=-1, keepdims=True))
    att = p * pl.reciprocal(jnp.sum(p, axis=-1, keepdims=True), approx=True)
    gat = jnp.einsum('bij,bjk->bik', att, xw3,
                     preferred_element_type=F32) + r32(7)
    lv2 = _layer_norm(gat, r32(10), r32(11)).reshape(B * N2, H)

    # --- InterPropagation Source2Token: level 2 -> level 3 ---
    lv3 = _source2token_pool(lv2, m32_ref[...], s2t23w1_ref[...],
                             rl(4), rl(5), rl(6), rl(7))         # (B*N3, H)

    # --- level_3_strategy='concat' + agg_strategy='concat' (static slices) ---
    rows = []
    for b in range(B):
        pieces = []
        for g in range(N3):
            i1 = b * N1 + ind13[g]                               # static index
            i3 = b * N3 + g
            pieces.append(lv1[i1:i1 + 1, :])
            pieces.append(lv3[i3:i3 + 1, :])
        rows.append(jnp.concatenate(pieces, axis=-1))            # (1, N3*2H)
    pvec = jnp.concatenate(rows, axis=0)                         # (B, N3*2H)

    # --- MLP head: Linear -> BN(eval) -> ReLU -> Linear -> BN -> ReLU -> Linear
    h = jnp.dot(pvec, mlpw1_ref[...], preferred_element_type=F32) + r128(0)
    h = jnp.maximum(h * r128(1) + r128(2), 0.0)
    h = jnp.dot(h, mlpw2_ref[...], preferred_element_type=F32) + r128(3)
    h = jnp.maximum(h * r128(4) + r128(5), 0.0)
    out = jnp.sum(h * r128(6), axis=-1, keepdims=True) + b3_ref[...]
    o_ref[...] = out


# ------------------------------ pallas_call glue ------------------------------

def _vmem_specs(n):
    return [pl.BlockSpec(memory_space=pltpu.MemorySpace.VMEM) for _ in range(n)]


def pack_params(p):
    """Pack the many tiny parameter vectors into a few VMEM-friendly matrices."""
    vec32 = jnp.concatenate([
        p['gcn1_w'], p['gcn1_b'], p['gcn1_g'], p['gcn1_be'],
        p['gcn2_b'], p['gcn2_g'], p['gcn2_be'],
        p['gat_b'], p['gat_asrc'], p['gat_adst'], p['gat_g'], p['gat_be']],
        axis=0)                                                  # (12, H)
    vecl = jnp.concatenate([
        p['s2t12_b1'], p['s2t12_g'], p['s2t12_be'], p['s2t12_w2'],
        p['s2t23_b1'], p['s2t23_g'], p['s2t23_be'], p['s2t23_w2']],
        axis=0)                                                  # (8, 4H)
    vec128 = jnp.concatenate([
        p['mlp_b1'], p['bn1_scale'], p['bn1_shift'],
        p['mlp_b2'], p['bn2_scale'], p['bn2_shift'],
        p['mlp_w3'].reshape(1, -1)], axis=0)                     # (7, 128)
    # NOTE: s2t12_b2 / s2t23_b2 shift every softmax logit equally and thus have
    # exactly zero effect on the output -> intentionally not passed in.
    return (vec32, vecl, vec128, p['gcn2_w'], p['gat_w'],
            p['s2t12_w1'], p['s2t23_w1'], p['mlp_w1'], p['mlp_w2'], p['mlp_b3'])


def mlkg_forward(params, x, adj1b, adj2_mask, m21b, m32b, *, dims, ind13):
    B, N1, N2, N3, H = dims
    packed = pack_params(params)
    kernel = functools.partial(_mlkg_fused_kernel, B, N1, N2, N3, H, ind13)
    fused = pl.pallas_call(
        kernel,
        out_shape=jax.ShapeDtypeStruct((B, 1), F32),
        in_specs=_vmem_specs(15),
        out_specs=pl.BlockSpec(memory_space=pltpu.MemorySpace.VMEM),
    )
    x_col = x.astype(F32).reshape(B * N1, 1)   # matches view(-1, input_dim)
    return fused(x_col, adj1b, adj2_mask, m21b, m32b, *packed)


# ----------------------- graph structure (static, numpy) ----------------------

def build_gcn_norm_adj(edge_index, n):
    src, dst = edge_index
    A = np.zeros((n, n), np.float32)
    A[dst, src] = 1.0
    A = A + np.eye(n, dtype=np.float32)        # GCNConv add_self_loops default
    deg = A.sum(axis=1)
    dinv = 1.0 / np.sqrt(deg)
    return (dinv[:, None] * A * dinv[None, :]).astype(np.float32)


def build_gat_adj_mask(edge_index, n):
    src, dst = edge_index
    M = np.zeros((n, n), np.float32)
    M[dst, src] = 1.0
    np.fill_diagonal(M, 1.0)                   # GATConv add_self_loops default
    return M


def block_diag_repeat(M, reps):
    r, c = M.shape
    out = np.zeros((reps * r, reps * c), np.float32)
    for i in range(reps):
        out[i * r:(i + 1) * r, i * c:(i + 1) * c] = M
    return out


# --------------------------------- parameters ---------------------------------

def init_params(key, H, in_dim, gnn_out_dim):
    keys = jax.random.split(key, 16)
    it = iter(keys)

    def w(shape, scale=0.1):
        return jax.random.normal(next(it), shape, F32) * scale

    latent = 4 * H
    bn_scale = jnp.full((1, 128), 1.0 / np.sqrt(1.0 + EPS), F32)  # eval BN fold
    bn_shift = jnp.zeros((1, 128), F32)

    p = {
        # ConvBlock_v1 #1 (GCN in_dim -> H), ConvBlock_v1 #2 (GCN H -> H, residual)
        'gcn1_w': w((in_dim, H)), 'gcn1_b': jnp.zeros((1, H), F32),
        'gcn1_g': jnp.ones((1, H), F32), 'gcn1_be': jnp.zeros((1, H), F32),
        'gcn2_w': w((H, H)), 'gcn2_b': jnp.zeros((1, H), F32),
        'gcn2_g': jnp.ones((1, H), F32), 'gcn2_be': jnp.zeros((1, H), F32),
        # Source2Token (level_12)
        's2t12_w1': w((H, latent)), 's2t12_b1': jnp.zeros((1, latent), F32),
        's2t12_g': jnp.ones((1, latent), F32), 's2t12_be': jnp.zeros((1, latent), F32),
        's2t12_w2': w((1, latent)), 's2t12_b2': jnp.zeros((1, 1), F32),
        # ConvBlock_v2 (GAT H -> H, heads=1)
        'gat_w': w((H, H)), 'gat_b': jnp.zeros((1, H), F32),
        'gat_asrc': w((1, H)), 'gat_adst': w((1, H)),
        'gat_g': jnp.ones((1, H), F32), 'gat_be': jnp.zeros((1, H), F32),
        # Source2Token (level_23)
        's2t23_w1': w((H, latent)), 's2t23_b1': jnp.zeros((1, latent), F32),
        's2t23_g': jnp.ones((1, latent), F32), 's2t23_be': jnp.zeros((1, latent), F32),
        's2t23_w2': w((1, latent)), 's2t23_b2': jnp.zeros((1, 1), F32),
        # MLP head [gnn_out_dim, 128, 128, 1]
        'mlp_w1': w((gnn_out_dim, 128)), 'mlp_b1': jnp.zeros((1, 128), F32),
        'bn1_scale': bn_scale, 'bn1_shift': bn_shift,
        'mlp_w2': w((128, 128)), 'mlp_b2': jnp.zeros((1, 128), F32),
        'bn2_scale': bn_scale, 'bn2_shift': bn_shift,
        'mlp_w3': w((128, 1)), 'mlp_b3': jnp.zeros((1, 1), F32),
    }
    return p


# ----------------------------------- main --------------------------------------

if __name__ == "__main__":
    B, N1, N2, N3, H = 2, 16, 8, 4, 32   # batch, level-1/2/3 nodes, hidden_dim
    IN_DIM = 1                           # attributes=None -> input_dim = 1

    # bidirectional ring graphs for level-1 and level-2
    s1 = np.arange(N1); d1 = (np.arange(N1) + 1) % N1
    e1 = np.stack([np.concatenate([s1, d1]), np.concatenate([d1, s1])])
    s2 = np.arange(N2); d2 = (np.arange(N2) + 1) % N2
    e2 = np.stack([np.concatenate([s2, d2]), np.concatenate([d2, s2])])

    adj1_hat = build_gcn_norm_adj(e1, N1)              # (N1, N1)
    adj2_mask = build_gat_adj_mask(e2, N2)             # (N2, N2)

    # level_21_indicator: each lv2 node pools 2 lv1 nodes; level_32: each lv3 pools 2 lv2
    ind21 = np.zeros((N2, N1), np.float32)
    for j in range(N1):
        ind21[j // (N1 // N2), j] = 1.0
    ind32 = np.zeros((N3, N2), np.float32)
    for j in range(N2):
        ind32[j // (N2 // N3), j] = 1.0
    ind13 = tuple(int(i) for i in (np.arange(N3) * (N1 // N3)))  # level_13_indicator

    # batched (block-diagonal) graph structure, built once on the host
    adj1b = jnp.asarray(block_diag_repeat(adj1_hat, B))   # (B*N1, B*N1)
    adj2m = jnp.asarray(adj2_mask)                        # (N2, N2)
    m21b = jnp.asarray(block_diag_repeat(ind21, B))       # (B*N2, B*N1)
    m32b = jnp.asarray(block_diag_repeat(ind32, B))       # (B*N3, B*N2)

    gnn_out_dim = N3 * 2 * H   # level_3_strategy='concat', agg_strategy='concat'

    key = jax.random.PRNGKey(0)
    kx, kp = jax.random.split(key)
    params = init_params(kp, H, IN_DIM, gnn_out_dim)
    x = jax.random.normal(kx, (B, N1), F32)               # (batch_num, level_1_nodes)

    fwd = jax.jit(functools.partial(mlkg_forward,
                                    dims=(B, N1, N2, N3, H), ind13=ind13))
    out = jax.block_until_ready(fwd(params, x, adj1b, adj2m, m21b, m32b))

    assert out.shape == (B, 1), out.shape
    assert bool(jnp.all(jnp.isfinite(out)))
    print("KERNEL_OK")
</pallas_src>

<mosaic_0001>
module attributes {stable_mosaic.version = 11 : i64} {
  func.func @_mlkg_fused_kernel(%arg0: memref<32x1xf32, #tpu.memory_space<vmem>>, %arg1: memref<32x32xf32, #tpu.memory_space<vmem>>, %arg2: memref<8x8xf32, #tpu.memory_space<vmem>>, %arg3: memref<16x32xf32, #tpu.memory_space<vmem>>, %arg4: memref<8x16xf32, #tpu.memory_space<vmem>>, %arg5: memref<12x32xf32, #tpu.memory_space<vmem>>, %arg6: memref<8x128xf32, #tpu.memory_space<vmem>>, %arg7: memref<7x128xf32, #tpu.memory_space<vmem>>, %arg8: memref<32x32xf32, #tpu.memory_space<vmem>>, %arg9: memref<32x32xf32, #tpu.memory_space<vmem>>, %arg10: memref<32x128xf32, #tpu.memory_space<vmem>>, %arg11: memref<32x128xf32, #tpu.memory_space<vmem>>, %arg12: memref<256x128xf32, #tpu.memory_space<vmem>>, %arg13: memref<128x128xf32, #tpu.memory_space<vmem>>, %arg14: memref<1x1xf32, #tpu.memory_space<vmem>>, %arg15: memref<2x1xf32, #tpu.memory_space<vmem>>) attributes {dimension_semantics = [], scalar_prefetch = 0 : i64, scratch_operands = 0 : i64, tpu.core_type = #tpu.core_type<tc>} {
    %c0 = arith.constant 0 : index
    %c0_0 = arith.constant 0 : index
    %0 = vector.load %arg5[%c0, %c0_0] : memref<12x32xf32, #tpu.memory_space<vmem>>, vector<12x32xf32>
    %c0_1 = arith.constant 0 : index
    %c0_2 = arith.constant 0 : index
    %1 = vector.load %arg6[%c0_1, %c0_2] : memref<8x128xf32, #tpu.memory_space<vmem>>, vector<8x128xf32>
    %c0_3 = arith.constant 0 : index
    %c0_4 = arith.constant 0 : index
    %2 = vector.load %arg7[%c0_3, %c0_4] : memref<7x128xf32, #tpu.memory_space<vmem>>, vector<7x128xf32>
    %c0_5 = arith.constant 0 : index
    %c0_6 = arith.constant 0 : index
    %3 = vector.load %arg1[%c0_5, %c0_6] : memref<32x32xf32, #tpu.memory_space<vmem>>, vector<32x32xf32>
    %c0_7 = arith.constant 0 : index
    %c0_8 = arith.constant 0 : index
    %4 = vector.load %arg0[%c0_7, %c0_8] : memref<32x1xf32, #tpu.memory_space<vmem>>, vector<32x1xf32>
    %5 = vector.extract_strided_slice %0 {offsets = [0, 0], sizes = [1, 32], strides = [1, 1]} : vector<12x32xf32> to vector<1x32xf32>
    %6 = vector.broadcast %4 : vector<32x1xf32> to vector<32x32xf32>
    %7 = vector.broadcast %5 : vector<1x32xf32> to vector<32x32xf32>
    %8 = arith.mulf %6, %7 : vector<32x32xf32>
    %cst = arith.constant dense<0.000000e+00> : vector<32x32xf32>
    %9 = tpu.matmul %3, %8, %cst {dimension_numbers = #tpu.dot_dimension_numbers<[1], [0], [0], [1], [0, 0, 1, 1], [], []>} : vector<32x32xf32>, vector<32x32xf32>, vector<32x32xf32> -> vector<32x32xf32>
    %10 = vector.extract_strided_slice %0 {offsets = [1, 0], sizes = [1, 32], strides = [1, 1]} : vector<12x32xf32> to vector<1x32xf32>
    %11 = vector.broadcast %10 : vector<1x32xf32> to vector<32x32xf32>
    %12 = arith.addf %9, %11 : vector<32x32xf32>
    %13 = vector.extract_strided_slice %0 {offsets = [2, 0], sizes = [1, 32], strides = [1, 1]} : vector<12x32xf32> to vector<1x32xf32>
    %14 = vector.extract_strided_slice %0 {offsets = [3, 0], sizes = [1, 32], strides = [1, 1]} : vector<12x32xf32> to vector<1x32xf32>
    %cst_9 = arith.constant dense<0.000000e+00> : vector<32xf32>
    %15 = vector.multi_reduction <add>, %12, %cst_9 [1] : vector<32x32xf32> to vector<32xf32>
    %16 = vector.shape_cast %15 : vector<32xf32> to vector<32x1xf32>
    %cst_10 = arith.constant 3.200000e+01 : f32
    %17 = vector.broadcast %cst_10 : f32 to vector<32x1xf32>
    %18 = arith.divf %16, %17 : vector<32x1xf32>
    %19 = vector.broadcast %18 : vector<32x1xf32> to vector<32x32xf32>
    %20 = arith.subf %12, %19 : vector<32x32xf32>
    %21 = arith.mulf %20, %20 : vector<32x32xf32>
    %cst_11 = arith.constant dense<0.000000e+00> : vector<32xf32>
    %22 = vector.multi_reduction <add>, %21, %cst_11 [1] : vector<32x32xf32> to vector<32xf32>
    %23 = vector.shape_cast %22 : vector<32xf32> to vector<32x1xf32>
    %cst_12 = arith.constant 3.200000e+01 : f32
    %24 = vector.broadcast %cst_12 : f32 to vector<32x1xf32>
    %25 = arith.divf %23, %24 : vector<32x1xf32>
    %26 = vector.broadcast %18 : vector<32x1xf32> to vector<32x32xf32>
    %27 = arith.subf %12, %26 : vector<32x32xf32>
    %cst_13 = arith.constant 9.99999974E-6 : f32
    %28 = vector.broadcast %cst_13 : f32 to vector<32x1xf32>
    %29 = arith.addf %25, %28 : vector<32x1xf32>
    %30 = math.rsqrt %29 : vector<32x1xf32>
    %31 = vector.broadcast %30 : vector<32x1xf32> to vector<32x32xf32>
    %32 = arith.mulf %27, %31 : vector<32x32xf32>
    %33 = vector.broadcast %13 : vector<1x32xf32> to vector<32x32xf32>
    %34 = arith.mulf %32, %33 : vector<32x32xf32>
    %35 = vector.broadcast %14 : vector<1x32xf32> to vector<32x32xf32>
    %36 = arith.addf %34, %35 : vector<32x32xf32>
    %c0_14 = arith.constant 0 : index
    %c0_15 = arith.constant 0 : index
    %37 = vector.load %arg8[%c0_14, %c0_15] : memref<32x32xf32, #tpu.memory_space<vmem>>, vector<32x32xf32>
    %cst_16 = arith.constant dense<0.000000e+00> : vector<32x32xf32>
    %38 = tpu.matmul %36, %37, %cst_16 {dimension_numbers = #tpu.dot_dimension_numbers<[1], [0], [0], [1], [0, 0, 1, 1], [], []>} : vector<32x32xf32>, vector<32x32xf32>, vector<32x32xf32> -> vector<32x32xf32>
    %cst_17 = arith.constant dense<0.000000e+00> : vector<32x32xf32>
    %39 = tpu.matmul %3, %38, %cst_17 {dimension_numbers = #tpu.dot_dimension_numbers<[1], [0], [0], [1], [0, 0, 1, 1], [], []>} : vector<32x32xf32>, vector<32x32xf32>, vector<32x32xf32> -> vector<32x32xf32>
    %40 = vector.extract_strided_slice %0 {offsets = [4, 0], sizes = [1, 32], strides = [1, 1]} : vector<12x32xf32> to vector<1x32xf32>
    %41 = vector.broadcast %40 : vector<1x32xf32> to vector<32x32xf32>
    %42 = arith.addf %39, %41 : vector<32x32xf32>
    %43 = vector.extract_strided_slice %0 {offsets = [5, 0], sizes = [1, 32], strides = [1, 1]} : vector<12x32xf32> to vector<1x32xf32>
    %44 = vector.extract_strided_slice %0 {offsets = [6, 0], sizes = [1, 32], strides = [1, 1]} : vector<12x32xf32> to vector<1x32xf32>
    %cst_18 = arith.constant dense<0.000000e+00> : vector<32xf32>
    %45 = vector.multi_reduction <add>, %42, %cst_18 [1] : vector<32x32xf32> to vector<32xf32>
    %46 = vector.shape_cast %45 : vector<32xf32> to vector<32x1xf32>
    %cst_19 = arith.constant 3.200000e+01 : f32
    %47 = vector.broadcast %cst_19 : f32 to vector<32x1xf32>
    %48 = arith.divf %46, %47 : vector<32x1xf32>
    %49 = vector.broadcast %48 : vector<32x1xf32> to vector<32x32xf32>
    %50 = arith.subf %42, %49 : vector<32x32xf32>
    %51 = arith.mulf %50, %50 : vector<32x32xf32>
    %cst_20 = arith.constant dense<0.000000e+00> : vector<32xf32>
    %52 = vector.multi_reduction <add>, %51, %cst_20 [1] : vector<32x32xf32> to vector<32xf32>
    %53 = vector.shape_cast %52 : vector<32xf32> to vector<32x1xf32>
    %cst_21 = arith.constant 3.200000e+01 : f32
    %54 = vector.broadcast %cst_21 : f32 to vector<32x1xf32>
    %55 = arith.divf %53, %54 : vector<32x1xf32>
    %56 = vector.broadcast %48 : vector<32x1xf32> to vector<32x32xf32>
    %57 = arith.subf %42, %56 : vector<32x32xf32>
    %cst_22 = arith.constant 9.99999974E-6 : f32
    %58 = vector.broadcast %cst_22 : f32 to vector<32x1xf32>
    %59 = arith.addf %55, %58 : vector<32x1xf32>
    %60 = math.rsqrt %59 : vector<32x1xf32>
    %61 = vector.broadcast %60 : vector<32x1xf32> to vector<32x32xf32>
    %62 = arith.mulf %57, %61 : vector<32x32xf32>
    %63 = vector.broadcast %43 : vector<1x32xf32> to vector<32x32xf32>
    %64 = arith.mulf %62, %63 : vector<32x32xf32>
    %65 = vector.broadcast %44 : vector<1x32xf32> to vector<32x32xf32>
    %66 = arith.addf %64, %65 : vector<32x32xf32>
    %67 = arith.addf %36, %66 : vector<32x32xf32>
    %c0_23 = arith.constant 0 : index
    %c0_24 = arith.constant 0 : index
    %68 = vector.load %arg3[%c0_23, %c0_24] : memref<16x32xf32, #tpu.memory_space<vmem>>, vector<16x32xf32>
    %c0_25 = arith.constant 0 : index
    %c0_26 = arith.constant 0 : index
    %69 = vector.load %arg10[%c0_25, %c0_26] : memref<32x128xf32, #tpu.memory_space<vmem>>, vector<32x128xf32>
    %70 = vector.extract_strided_slice %1 {offsets = [0, 0], sizes = [1, 128], strides = [1, 1]} : vector<8x128xf32> to vector<1x128xf32>
    %71 = vector.extract_strided_slice %1 {offsets = [1, 0], sizes = [1, 128], strides = [1, 1]} : vector<8x128xf32> to vector<1x128xf32>
    %72 = vector.extract_strided_slice %1 {offsets = [2, 0], sizes = [1, 128], strides = [1, 1]} : vector<8x128xf32> to vector<1x128xf32>
    %73 = vector.extract_strided_slice %1 {offsets = [3, 0], sizes = [1, 128], strides = [1, 1]} : vector<8x128xf32> to vector<1x128xf32>
    %cst_27 = arith.constant dense<0.000000e+00> : vector<32x128xf32>
    %74 = tpu.matmul %67, %69, %cst_27 {dimension_numbers = #tpu.dot_dimension_numbers<[1], [0], [0], [1], [0, 0, 1, 1], [], []>} : vector<32x32xf32>, vector<32x128xf32>, vector<32x128xf32> -> vector<32x128xf32>
    %75 = vector.broadcast %70 : vector<1x128xf32> to vector<32x128xf32>
    %76 = arith.addf %74, %75 : vector<32x128xf32>
    %cst_28 = arith.constant dense<0.000000e+00> : vector<32xf32>
    %77 = vector.multi_reduction <add>, %76, %cst_28 [1] : vector<32x128xf32> to vector<32xf32>
    %78 = vector.shape_cast %77 : vector<32xf32> to vector<32x1xf32>
    %cst_29 = arith.constant 1.280000e+02 : f32
    %79 = vector.broadcast %cst_29 : f32 to vector<32x1xf32>
    %80 = arith.divf %78, %79 : vector<32x1xf32>
    %81 = vector.broadcast %80 : vector<32x1xf32> to vector<32x128xf32>
    %82 = arith.subf %76, %81 : vector<32x128xf32>
    %83 = arith.mulf %82, %82 : vector<32x128xf32>
    %cst_30 = arith.constant dense<0.000000e+00> : vector<32xf32>
    %84 = vector.multi_reduction <add>, %83, %cst_30 [1] : vector<32x128xf32> to vector<32xf32>
    %85 = vector.shape_cast %84 : vector<32xf32> to vector<32x1xf32>
    %cst_31 = arith.constant 1.280000e+02 : f32
    %86 = vector.broadcast %cst_31 : f32 to vector<32x1xf32>
    %87 = arith.divf %85, %86 : vector<32x1xf32>
    %88 = vector.broadcast %80 : vector<32x1xf32> to vector<32x128xf32>
    %89 = arith.subf %76, %88 : vector<32x128xf32>
    %cst_32 = arith.constant 9.99999974E-6 : f32
    %90 = vector.broadcast %cst_32 : f32 to vector<32x1xf32>
    %91 = arith.addf %87, %90 : vector<32x1xf32>
    %92 = math.rsqrt %91 : vector<32x1xf32>
    %93 = vector.broadcast %92 : vector<32x1xf32> to vector<32x128xf32>
    %94 = arith.mulf %89, %93 : vector<32x128xf32>
    %95 = vector.broadcast %71 : vector<1x128xf32> to vector<32x128xf32>
    %96 = arith.mulf %94, %95 : vector<32x128xf32>
    %97 = vector.broadcast %72 : vector<1x128xf32> to vector<32x128xf32>
    %98 = arith.addf %96, %97 : vector<32x128xf32>
    %99 = math.tanh %98 : vector<32x128xf32>
    %100 = vector.broadcast %73 : vector<1x128xf32> to vector<32x128xf32>
    %101 = arith.mulf %99, %100 : vector<32x128xf32>
    %cst_33 = arith.constant dense<0.000000e+00> : vector<32xf32>
    %102 = vector.multi_reduction <add>, %101, %cst_33 [1] : vector<32x128xf32> to vector<32xf32>
    %103 = vector.shape_cast %102 : vector<32xf32> to vector<32x1xf32>
    %cst_34 = arith.constant dense<0xFF800000> : vector<1xf32>
    %104 = vector.multi_reduction <maximumf>, %103, %cst_34 [0] : vector<32x1xf32> to vector<1xf32>
    %105 = vector.shape_cast %104 : vector<1xf32> to vector<1x1xf32>
    %106 = vector.broadcast %105 : vector<1x1xf32> to vector<32x1xf32>
    %107 = arith.subf %103, %106 : vector<32x1xf32>
    %108 = math.exp %107 : vector<32x1xf32>
    %109 = vector.broadcast %108 : vector<32x1xf32> to vector<32x32xf32>
    %110 = arith.mulf %109, %67 : vector<32x32xf32>
    %cst_35 = arith.constant dense<0.000000e+00> : vector<16x32xf32>
    %111 = tpu.matmul %68, %110, %cst_35 {dimension_numbers = #tpu.dot_dimension_numbers<[1], [0], [0], [1], [0, 0, 1, 1], [], []>} : vector<16x32xf32>, vector<32x32xf32>, vector<16x32xf32> -> vector<16x32xf32>
    %cst_36 = arith.constant dense<0.000000e+00> : vector<16x1xf32>
    %112 = tpu.matmul %68, %108, %cst_36 {dimension_numbers = #tpu.dot_dimension_numbers<[1], [0], [0], [1], [0, 0, 1, 1], [], []>} : vector<16x32xf32>, vector<32x1xf32>, vector<16x1xf32> -> vector<16x1xf32>
    %cst_37 = arith.constant 9.99999968E-21 : f32
    %113 = vector.broadcast %cst_37 : f32 to vector<16x1xf32>
    %114 = arith.maximumf %112, %113 : vector<16x1xf32>
    %115 = tpu.reciprocal %114 {approx = true} : vector<16x1xf32> -> vector<16x1xf32>
    %116 = vector.broadcast %115 : vector<16x1xf32> to vector<16x32xf32>
    %117 = arith.mulf %111, %116 : vector<16x32xf32>
    %118 = vector.shape_cast %117 : vector<16x32xf32> to vector<2x8x32xf32>
    %c0_38 = arith.constant 0 : index
    %c0_39 = arith.constant 0 : index
    %119 = vector.load %arg9[%c0_38, %c0_39] : memref<32x32xf32, #tpu.memory_space<vmem>>, vector<32x32xf32>
    "tpu.trace_start"() <{level = 10 : i32, message = "bnh,hk->bnk"}> : () -> ()
    %cst_40 = arith.constant dense<0.000000e+00> : vector<2x8x32xf32>
    %120 = tpu.matmul %118, %119, %cst_40 {dimension_numbers = #tpu.dot_dimension_numbers<[2], [0], [0, 1], [1], [0, 0, 0, 1, 1, 1], [], []>} : vector<2x8x32xf32>, vector<32x32xf32>, vector<2x8x32xf32> -> vector<2x8x32xf32>
    "tpu.trace_stop"() : () -> ()
    %121 = vector.extract_strided_slice %0 {offsets = [8, 0], sizes = [1, 32], strides = [1, 1]} : vector<12x32xf32> to vector<1x32xf32>
    %122 = vector.shape_cast %121 : vector<1x32xf32> to vector<1x1x32xf32>
    %123 = vector.broadcast %122 : vector<1x1x32xf32> to vector<2x8x32xf32>
    %124 = arith.mulf %120, %123 : vector<2x8x32xf32>
    %cst_41 = arith.constant dense<0.000000e+00> : vector<2x8xf32>
    %125 = vector.multi_reduction <add>, %124, %cst_41 [2] : vector<2x8x32xf32> to vector<2x8xf32>
    %126 = vector.extract_strided_slice %0 {offsets = [9, 0], sizes = [1, 32], strides = [1, 1]} : vector<12x32xf32> to vector<1x32xf32>
    %127 = vector.shape_cast %126 : vector<1x32xf32> to vector<1x1x32xf32>
    %128 = vector.broadcast %127 : vector<1x1x32xf32> to vector<2x8x32xf32>
    %129 = arith.mulf %120, %128 : vector<2x8x32xf32>
    %cst_42 = arith.constant dense<0.000000e+00> : vector<2x8xf32>
    %130 = vector.multi_reduction <add>, %129, %cst_42 [2] : vector<2x8x32xf32> to vector<2x8xf32>
    %131 = vector.shape_cast %130 : vector<2x8xf32> to vector<2x8x1xf32>
    %132 = vector.shape_cast %125 : vector<2x8xf32> to vector<2x1x8xf32>
    %133 = vector.broadcast %131 : vector<2x8x1xf32> to vector<2x8x8xf32>
    %134 = vector.broadcast %132 : vector<2x1x8xf32> to vector<2x8x8xf32>
    %135 = arith.addf %133, %134 : vector<2x8x8xf32>
    %cst_43 = arith.constant 0.000000e+00 : f32
    %136 = vector.broadcast %cst_43 : f32 to vector<2x8x8xf32>
    %137 = arith.cmpf ogt, %135, %136 : vector<2x8x8xf32>
    %cst_44 = arith.constant 2.000000e-01 : f32
    %138 = vector.broadcast %cst_44 : f32 to vector<2x8x8xf32>
    %139 = arith.mulf %138, %135 : vector<2x8x8xf32>
    %140 = arith.select %137, %135, %139 : vector<2x8x8xi1>, vector<2x8x8xf32>
    %c0_45 = arith.constant 0 : index
    %c0_46 = arith.constant 0 : index
    %141 = vector.load %arg2[%c0_45, %c0_46] : memref<8x8xf32, #tpu.memory_space<vmem>>, vector<8x8xf32>
    %142 = vector.shape_cast %141 : vector<8x8xf32> to vector<1x8x8xf32>
    %cst_47 = arith.constant 0.000000e+00 : f32
    %143 = vector.broadcast %cst_47 : f32 to vector<1x8x8xf32>
    %144 = arith.cmpf ogt, %142, %143 : vector<1x8x8xf32>
    %cst_48 = arith.constant -1.000000e+30 : f32
    %145 = vector.shape_cast %144 : vector<1x8x8xi1> to vector<1x8x8xi1>
    %146 = vector.broadcast %145 : vector<1x8x8xi1> to vector<2x8x8xi1>
    %147 = vector.broadcast %cst_48 : f32 to vector<2x8x8xf32>
    %148 = arith.select %146, %140, %147 : vector<2x8x8xi1>, vector<2x8x8xf32>
    %cst_49 = arith.constant dense<0xFF800000> : vector<2x8xf32>
    %149 = vector.multi_reduction <maximumf>, %148, %cst_49 [2] : vector<2x8x8xf32> to vector<2x8xf32>
    %150 = vector.shape_cast %149 : vector<2x8xf32> to vector<2x8x1xf32>
    %151 = vector.broadcast %150 : vector<2x8x1xf32> to vector<2x8x8xf32>
    %152 = arith.subf %148, %151 : vector<2x8x8xf32>
    %153 = math.exp %152 : vector<2x8x8xf32>
    %cst_50 = arith.constant dense<0.000000e+00> : vector<2x8xf32>
    %154 = vector.multi_reduction <add>, %153, %cst_50 [2] : vector<2x8x8xf32> to vector<2x8xf32>
    %155 = vector.shape_cast %154 : vector<2x8xf32> to vector<2x8x1xf32>
    %156 = tpu.reciprocal %155 {approx = true} : vector<2x8x1xf32> -> vector<2x8x1xf32>
    %157 = vector.broadcast %156 : vector<2x8x1xf32> to vector<2x8x8xf32>
    %158 = arith.mulf %153, %157 : vector<2x8x8xf32>
    "tpu.trace_start"() <{level = 10 : i32, message = "bij,bjk->bik"}> : () -> ()
    %cst_51 = arith.constant dense<0.000000e+00> : vector<2x8x32xf32>
    %159 = tpu.matmul %158, %120, %cst_51 {dimension_numbers = #tpu.dot_dimension_numbers<[2], [1], [1], [2], [0, 0, 0, 1, 1, 2], [0], [0]>} : vector<2x8x8xf32>, vector<2x8x32xf32>, vector<2x8x32xf32> -> vector<2x8x32xf32>
    "tpu.trace_stop"() : () -> ()
    %160 = vector.extract_strided_slice %0 {offsets = [7, 0], sizes = [1, 32], strides = [1, 1]} : vector<12x32xf32> to vector<1x32xf32>
    %161 = vector.shape_cast %160 : vector<1x32xf32> to vector<1x1x32xf32>
    %162 = vector.broadcast %161 : vector<1x1x32xf32> to vector<2x8x32xf32>
    %163 = arith.addf %159, %162 : vector<2x8x32xf32>
    %164 = vector.extract_strided_slice %0 {offsets = [10, 0], sizes = [1, 32], strides = [1, 1]} : vector<12x32xf32> to vector<1x32xf32>
    %165 = vector.extract_strided_slice %0 {offsets = [11, 0], sizes = [1, 32], strides = [1, 1]} : vector<12x32xf32> to vector<1x32xf32>
    %cst_52 = arith.constant dense<0.000000e+00> : vector<2x8xf32>
    %166 = vector.multi_reduction <add>, %163, %cst_52 [2] : vector<2x8x32xf32> to vector<2x8xf32>
    %167 = vector.shape_cast %166 : vector<2x8xf32> to vector<2x8x1xf32>
    %cst_53 = arith.constant 3.200000e+01 : f32
    %168 = vector.broadcast %cst_53 : f32 to vector<2x8x1xf32>
    %169 = arith.divf %167, %168 : vector<2x8x1xf32>
    %170 = vector.broadcast %169 : vector<2x8x1xf32> to vector<2x8x32xf32>
    %171 = arith.subf %163, %170 : vector<2x8x32xf32>
    %172 = arith.mulf %171, %171 : vector<2x8x32xf32>
    %cst_54 = arith.constant dense<0.000000e+00> : vector<2x8xf32>
    %173 = vector.multi_reduction <add>, %172, %cst_54 [2] : vector<2x8x32xf32> to vector<2x8xf32>
    %174 = vector.shape_cast %173 : vector<2x8xf32> to vector<2x8x1xf32>
    %cst_55 = arith.constant 3.200000e+01 : f32
    %175 = vector.broadcast %cst_55 : f32 to vector<2x8x1xf32>
    %176 = arith.divf %174, %175 : vector<2x8x1xf32>
    %177 = vector.broadcast %169 : vector<2x8x1xf32> to vector<2x8x32xf32>
    %178 = arith.subf %163, %177 : vector<2x8x32xf32>
    %cst_56 = arith.constant 9.99999974E-6 : f32
    %179 = vector.broadcast %cst_56 : f32 to vector<2x8x1xf32>
    %180 = arith.addf %176, %179 : vector<2x8x1xf32>
    %181 = math.rsqrt %180 : vector<2x8x1xf32>
    %182 = vector.broadcast %181 : vector<2x8x1xf32> to vector<2x8x32xf32>
    %183 = arith.mulf %178, %182 : vector<2x8x32xf32>
    %184 = vector.shape_cast %164 : vector<1x32xf32> to vector<1x1x32xf32>
    %185 = vector.broadcast %184 : vector<1x1x32xf32> to vector<2x8x32xf32>
    %186 = arith.mulf %183, %185 : vector<2x8x32xf32>
    %187 = vector.shape_cast %165 : vector<1x32xf32> to vector<1x1x32xf32>
    %188 = vector.broadcast %187 : vector<1x1x32xf32> to vector<2x8x32xf32>
    %189 = arith.addf %186, %188 : vector<2x8x32xf32>
    %190 = vector.shape_cast %189 : vector<2x8x32xf32> to vector<16x32xf32>
    %c0_57 = arith.constant 0 : index
    %c0_58 = arith.constant 0 : index
    %191 = vector.load %arg4[%c0_57, %c0_58] : memref<8x16xf32, #tpu.memory_space<vmem>>, vector<8x16xf32>
    %c0_59 = arith.constant 0 : index
    %c0_60 = arith.constant 0 : index
    %192 = vector.load %arg11[%c0_59, %c0_60] : memref<32x128xf32, #tpu.memory_space<vmem>>, vector<32x128xf32>
    %193 = vector.extract_strided_slice %1 {offsets = [4, 0], sizes = [1, 128], strides = [1, 1]} : vector<8x128xf32> to vector<1x128xf32>
    %194 = vector.extract_strided_slice %1 {offsets = [5, 0], sizes = [1, 128], strides = [1, 1]} : vector<8x128xf32> to vector<1x128xf32>
    %195 = vector.extract_strided_slice %1 {offsets = [6, 0], sizes = [1, 128], strides = [1, 1]} : vector<8x128xf32> to vector<1x128xf32>
    %196 = vector.extract_strided_slice %1 {offsets = [7, 0], sizes = [1, 128], strides = [1, 1]} : vector<8x128xf32> to vector<1x128xf32>
    %cst_61 = arith.constant dense<0.000000e+00> : vector<16x128xf32>
    %197 = tpu.matmul %190, %192, %cst_61 {dimension_numbers = #tpu.dot_dimension_numbers<[1], [0], [0], [1], [0, 0, 1, 1], [], []>} : vector<16x32xf32>, vector<32x128xf32>, vector<16x128xf32> -> vector<16x128xf32>
    %198 = vector.broadcast %193 : vector<1x128xf32> to vector<16x128xf32>
    %199 = arith.addf %197, %198 : vector<16x128xf32>
    %cst_62 = arith.constant dense<0.000000e+00> : vector<16xf32>
    %200 = vector.multi_reduction <add>, %199, %cst_62 [1] : vector<16x128xf32> to vector<16xf32>
    %201 = vector.shape_cast %200 : vector<16xf32> to vector<16x1xf32>
    %cst_63 = arith.constant 1.280000e+02 : f32
    %202 = vector.broadcast %cst_63 : f32 to vector<16x1xf32>
    %203 = arith.divf %201, %202 : vector<16x1xf32>
    %204 = vector.broadcast %203 : vector<16x1xf32> to vector<16x128xf32>
    %205 = arith.subf %199, %204 : vector<16x128xf32>
    %206 = arith.mulf %205, %205 : vector<16x128xf32>
    %cst_64 = arith.constant dense<0.000000e+00> : vector<16xf32>
    %207 = vector.multi_reduction <add>, %206, %cst_64 [1] : vector<16x128xf32> to vector<16xf32>
    %208 = vector.shape_cast %207 : vector<16xf32> to vector<16x1xf32>
    %cst_65 = arith.constant 1.280000e+02 : f32
    %209 = vector.broadcast %cst_65 : f32 to vector<16x1xf32>
    %210 = arith.divf %208, %209 : vector<16x1xf32>
    %211 = vector.broadcast %203 : vector<16x1xf32> to vector<16x128xf32>
    %212 = arith.subf %199, %211 : vector<16x128xf32>
    %cst_66 = arith.constant 9.99999974E-6 : f32
    %213 = vector.broadcast %cst_66 : f32 to vector<16x1xf32>
    %214 = arith.addf %210, %213 : vector<16x1xf32>
    %215 = math.rsqrt %214 : vector<16x1xf32>
    %216 = vector.broadcast %215 : vector<16x1xf32> to vector<16x128xf32>
    %217 = arith.mulf %212, %216 : vector<16x128xf32>
    %218 = vector.broadcast %194 : vector<1x128xf32> to vector<16x128xf32>
    %219 = arith.mulf %217, %218 : vector<16x128xf32>
    %220 = vector.broadcast %195 : vector<1x128xf32> to vector<16x128xf32>
    %221 = arith.addf %219, %220 : vector<16x128xf32>
    %222 = math.tanh %221 : vector<16x128xf32>
    %223 = vector.broadcast %196 : vector<1x128xf32> to vector<16x128xf32>
    %224 = arith.mulf %222, %223 : vector<16x128xf32>
    %cst_67 = arith.constant dense<0.000000e+00> : vector<16xf32>
    %225 = vector.multi_reduction <add>, %224, %cst_67 [1] : vector<16x128xf32> to vector<16xf32>
    %226 = vector.shape_cast %225 : vector<16xf32> to vector<16x1xf32>
    %cst_68 = arith.constant dense<0xFF800000> : vector<1xf32>
    %227 = vector.multi_reduction <maximumf>, %226, %cst_68 [0] : vector<16x1xf32> to vector<1xf32>
    %228 = vector.shape_cast %227 : vector<1xf32> to vector<1x1xf32>
    %229 = vector.broadcast %228 : vector<1x1xf32> to vector<16x1xf32>
    %230 = arith.subf %226, %229 : vector<16x1xf32>
    %231 = math.exp %230 : vector<16x1xf32>
    %232 = vector.broadcast %231 : vector<16x1xf32> to vector<16x32xf32>
    %233 = arith.mulf %232, %190 : vector<16x32xf32>
    %cst_69 = arith.constant dense<0.000000e+00> : vector<8x32xf32>
    %234 = tpu.matmul %191, %233, %cst_69 {dimension_numbers = #tpu.dot_dimension_numbers<[1], [0], [0], [1], [0, 0, 1, 1], [], []>} : vector<8x16xf32>, vector<16x32xf32>, vector<8x32xf32> -> vector<8x32xf32>
    %cst_70 = arith.constant dense<0.000000e+00> : vector<8x1xf32>
    %235 = tpu.matmul %191, %231, %cst_70 {dimension_numbers = #tpu.dot_dimension_numbers<[1], [0], [0], [1], [0, 0, 1, 1], [], []>} : vector<8x16xf32>, vector<16x1xf32>, vector<8x1xf32> -> vector<8x1xf32>
    %cst_71 = arith.constant 9.99999968E-21 : f32
    %236 = vector.broadcast %cst_71 : f32 to vector<8x1xf32>
    %237 = arith.maximumf %235, %236 : vector<8x1xf32>
    %238 = tpu.reciprocal %237 {approx = true} : vector<8x1xf32> -> vector<8x1xf32>
    %239 = vector.broadcast %238 : vector<8x1xf32> to vector<8x32xf32>
    %240 = arith.mulf %234, %239 : vector<8x32xf32>
    %241 = vector.extract_strided_slice %67 {offsets = [0, 0], sizes = [1, 32], strides = [1, 1]} : vector<32x32xf32> to vector<1x32xf32>
    %242 = vector.extract_strided_slice %240 {offsets = [0, 0], sizes = [1, 32], strides = [1, 1]} : vector<8x32xf32> to vector<1x32xf32>
    %243 = vector.extract_strided_slice %67 {offsets = [4, 0], sizes = [1, 32], strides = [1, 1]} : vector<32x32xf32> to vector<1x32xf32>
    %244 = vector.extract_strided_slice %240 {offsets = [1, 0], sizes = [1, 32], strides = [1, 1]} : vector<8x32xf32> to vector<1x32xf32>
    %245 = vector.extract_strided_slice %67 {offsets = [8, 0], sizes = [1, 32], strides = [1, 1]} : vector<32x32xf32> to vector<1x32xf32>
    %246 = vector.extract_strided_slice %240 {offsets = [2, 0], sizes = [1, 32], strides = [1, 1]} : vector<8x32xf32> to vector<1x32xf32>
    %247 = vector.extract_strided_slice %67 {offsets = [12, 0], sizes = [1, 32], strides = [1, 1]} : vector<32x32xf32> to vector<1x32xf32>
    %248 = vector.extract_strided_slice %240 {offsets = [3, 0], sizes = [1, 32], strides = [1, 1]} : vector<8x32xf32> to vector<1x32xf32>
    %249 = tpu.concatenate %241, %242, %243, %244, %245, %246, %247, %248 in 1 : vector<1x32xf32>, vector<1x32xf32>, vector<1x32xf32>, vector<1x32xf32>, vector<1x32xf32>, vector<1x32xf32>, vector<1x32xf32>, vector<1x32xf32> -> vector<1x256xf32>
    %250 = vector.extract_strided_slice %67 {offsets = [16, 0], sizes = [1, 32], strides = [1, 1]} : vector<32x32xf32> to vector<1x32xf32>
    %251 = vector.extract_strided_slice %240 {offsets = [4, 0], sizes = [1, 32], strides = [1, 1]} : vector<8x32xf32> to vector<1x32xf32>
    %252 = vector.extract_strided_slice %67 {offsets = [20, 0], sizes = [1, 32], strides = [1, 1]} : vector<32x32xf32> to vector<1x32xf32>
    %253 = vector.extract_strided_slice %240 {offsets = [5, 0], sizes = [1, 32], strides = [1, 1]} : vector<8x32xf32> to vector<1x32xf32>
    %254 = vector.extract_strided_slice %67 {offsets = [24, 0], sizes = [1, 32], strides = [1, 1]} : vector<32x32xf32> to vector<1x32xf32>
    %255 = vector.extract_strided_slice %240 {offsets = [6, 0], sizes = [1, 32], strides = [1, 1]} : vector<8x32xf32> to vector<1x32xf32>
    %256 = vector.extract_strided_slice %67 {offsets = [28, 0], sizes = [1, 32], strides = [1, 1]} : vector<32x32xf32> to vector<1x32xf32>
    %257 = vector.extract_strided_slice %240 {offsets = [7, 0], sizes = [1, 32], strides = [1, 1]} : vector<8x32xf32> to vector<1x32xf32>
    %258 = tpu.concatenate %250, %251, %252, %253, %254, %255, %256, %257 in 1 : vector<1x32xf32>, vector<1x32xf32>, vector<1x32xf32>, vector<1x32xf32>, vector<1x32xf32>, vector<1x32xf32>, vector<1x32xf32>, vector<1x32xf32> -> vector<1x256xf32>
    %259 = tpu.concatenate %249, %258 in 0 : vector<1x256xf32>, vector<1x256xf32> -> vector<2x256xf32>
    %c0_72 = arith.constant 0 : index
    %c0_73 = arith.constant 0 : index
    %260 = vector.load %arg12[%c0_72, %c0_73] : memref<256x128xf32, #tpu.memory_space<vmem>>, vector<256x128xf32>
    %cst_74 = arith.constant dense<0.000000e+00> : vector<2x128xf32>
    %261 = tpu.matmul %259, %260, %cst_74 {dimension_numbers = #tpu.dot_dimension_numbers<[1], [0], [0], [1], [0, 0, 1, 1], [], []>} : vector<2x256xf32>, vector<256x128xf32>, vector<2x128xf32> -> vector<2x128xf32>
    %262 = vector.extract_strided_slice %2 {offsets = [0, 0], sizes = [1, 128], strides = [1, 1]} : vector<7x128xf32> to vector<1x128xf32>
    %263 = vector.broadcast %262 : vector<1x128xf32> to vector<2x128xf32>
    %264 = arith.addf %261, %263 : vector<2x128xf32>
    %265 = vector.extract_strided_slice %2 {offsets = [1, 0], sizes = [1, 128], strides = [1, 1]} : vector<7x128xf32> to vector<1x128xf32>
    %266 = vector.broadcast %265 : vector<1x128xf32> to vector<2x128xf32>
    %267 = arith.mulf %264, %266 : vector<2x128xf32>
    %268 = vector.extract_strided_slice %2 {offsets = [2, 0], sizes = [1, 128], strides = [1, 1]} : vector<7x128xf32> to vector<1x128xf32>
    %269 = vector.broadcast %268 : vector<1x128xf32> to vector<2x128xf32>
    %270 = arith.addf %267, %269 : vector<2x128xf32>
    %cst_75 = arith.constant 0.000000e+00 : f32
    %271 = vector.broadcast %cst_75 : f32 to vector<2x128xf32>
    %272 = arith.maximumf %270, %271 : vector<2x128xf32>
    %c0_76 = arith.constant 0 : index
    %c0_77 = arith.constant 0 : index
    %273 = vector.load %arg13[%c0_76, %c0_77] : memref<128x128xf32, #tpu.memory_space<vmem>>, vector<128x128xf32>
    %cst_78 = arith.constant dense<0.000000e+00> : vector<2x128xf32>
    %274 = tpu.matmul %272, %273, %cst_78 {dimension_numbers = #tpu.dot_dimension_numbers<[1], [0], [0], [1], [0, 0, 1, 1], [], []>} : vector<2x128xf32>, vector<128x128xf32>, vector<2x128xf32> -> vector<2x128xf32>
    %275 = vector.extract_strided_slice %2 {offsets = [3, 0], sizes = [1, 128], strides = [1, 1]} : vector<7x128xf32> to vector<1x128xf32>
    %276 = vector.broadcast %275 : vector<1x128xf32> to vector<2x128xf32>
    %277 = arith.addf %274, %276 : vector<2x128xf32>
    %278 = vector.extract_strided_slice %2 {offsets = [4, 0], sizes = [1, 128], strides = [1, 1]} : vector<7x128xf32> to vector<1x128xf32>
    %279 = vector.broadcast %278 : vector<1x128xf32> to vector<2x128xf32>
    %280 = arith.mulf %277, %279 : vector<2x128xf32>
    %281 = vector.extract_strided_slice %2 {offsets = [5, 0], sizes = [1, 128], strides = [1, 1]} : vector<7x128xf32> to vector<1x128xf32>
    %282 = vector.broadcast %281 : vector<1x128xf32> to vector<2x128xf32>
    %283 = arith.addf %280, %282 : vector<2x128xf32>
    %cst_79 = arith.constant 0.000000e+00 : f32
    %284 = vector.broadcast %cst_79 : f32 to vector<2x128xf32>
    %285 = arith.maximumf %283, %284 : vector<2x128xf32>
    %286 = vector.extract_strided_slice %2 {offsets = [6, 0], sizes = [1, 128], strides = [1, 1]} : vector<7x128xf32> to vector<1x128xf32>
    %287 = vector.broadcast %286 : vector<1x128xf32> to vector<2x128xf32>
    %288 = arith.mulf %285, %287 : vector<2x128xf32>
    %cst_80 = arith.constant dense<0.000000e+00> : vector<2xf32>
    %289 = vector.multi_reduction <add>, %288, %cst_80 [1] : vector<2x128xf32> to vector<2xf32>
    %290 = vector.shape_cast %289 : vector<2xf32> to vector<2x1xf32>
    %c0_81 = arith.constant 0 : index
    %c0_82 = arith.constant 0 : index
    %291 = vector.load %arg14[%c0_81, %c0_82] : memref<1x1xf32, #tpu.memory_space<vmem>>, vector<1x1xf32>
    %292 = vector.broadcast %291 : vector<1x1xf32> to vector<2x1xf32>
    %293 = arith.addf %290, %292 : vector<2x1xf32>
    %c0_83 = arith.constant 0 : index
    %c0_84 = arith.constant 0 : index
    %294 = vector.load %arg15[%c0_83, %c0_84] : memref<2x1xf32, #tpu.memory_space<vmem>>, vector<2x1xf32>
    tpu.vector_store %arg15[%c0_83, %c0_84], %293 {strides = array<i32>} : memref<2x1xf32, #tpu.memory_space<vmem>>, vector<2x1xf32>,
    return
  }
}

</mosaic_0001>

<bundles_post_ra>
// kernel: mlkg_forward.1
= control target key start
LH: loop header
LB: loop body
LE: loop exit
PB: predicated region body
PF: predicated region fallthrough
CT: control target
= control target key end

     0   :  { %s2997_s0 = inlined_call_operand.vmem [shape: f32[32,1], index: 0, kind: input, shape index: {}]   ;;  %s2998_s1 = inlined_call_operand.hbm [shape: f32[32,32], index: 1, kind: input, shape index: {}]   ;;  %s2999_s2 = inlined_call_operand.vmem [shape: f32[8,8], index: 2, kind: input, shape index: {}]   ;;  %s3000_s3 = inlined_call_operand.vmem [shape: f32[16,32], index: 3, kind: input, shape index: {}]   ;;  %s3001_s4 = inlined_call_operand.vmem [shape: f32[8,16], index: 4, kind: input, shape index: {}]   ;;  %s3002_s5 = inlined_call_operand.vmem [shape: f32[12,32], index: 5, kind: input, shape index: {}]   ;;  %s3003_s6 = inlined_call_operand.vmem [shape: f32[8,128], index: 6, kind: input, shape index: {}]   ;;  %s3004_s7 = inlined_call_operand.vmem [shape: f32[7,128], index: 7, kind: input, shape index: {}]   ;;  %s3005_s8 = inlined_call_operand.hbm [shape: f32[32,32], index: 8, kind: input, shape index: {}]   ;;  %s3006_s9 = inlined_call_operand.hbm [shape: f32[32,32], index: 9, kind: input, shape index: {}]   ;;  %s3007_s10 = inlined_call_operand.hbm [shape: f32[32,128], index: 10, kind: input, shape index: {}]   ;;  %s3008_s11 = inlined_call_operand.hbm [shape: f32[32,128], index: 11, kind: input, shape index: {}]   ;;  %s3009_s12 = inlined_call_operand.hbm [shape: f32[256,128], index: 12, kind: input, shape index: {}]   ;;  %s3010_s13 = inlined_call_operand.vmem [shape: f32[128,128], index: 13, kind: input, shape index: {}]   ;;  %s3011_s14 = inlined_call_operand.<no memory space> [shape: f32[1,1], index: 14, kind: input, shape index: {}]   ;;  %s3012_s15 = inlined_call_operand.vmem [shape: f32[2,1], index: 15, kind: output, shape index: {}]  }
   0x1   :  { %v20_v0 = vstv %s3011_s14 }
   0x2   :  { %21 = vst [vmem:[#allocation2] sm:$0x1] %v20_v0 }
   0x3   :  { %22 = vsyncpa [#allocation4], 0 }
   0x4   :  { %23 = vsyncpa [#allocation6], 0 }
   0x5   :  { %24 = vsyncpa [#allocation9], 0 }
   0x6   :  { %25 = vsyncpa [#allocation12], 0  ;;  %s2527_s20 = smov [#allocation5]   ;;  %s2528_s22 = smov [#allocation8]  }
   0x7   :  { %s57_s21 = sshll.u32 %s2527_s20, 4  ;;  %s81_s23 = sshll.u32 %s2528_s22, 4  ;;  %s58_s21 = int_to_ptr.vmem [resolvable:$true] %s57_s21  ;;  %s82_s23 = int_to_ptr.vmem [resolvable:$true] %s81_s23 }
   0x8   :  { %s2407_s24 = scalar_lea.vmem %s58_s21, 512  ;;  %p2412_p1 = scmp.lt.s32.totalorder %s58_s21, %s58_s21 }
   0x9   :  { %p2408_p0 = scmp.ne.s32.totalorder %s58_s21, %s2407_s24  ;;  %p2413_p2 = scmp.lt.s32.totalorder %s2407_s24, %s2407_s24 }
   0xb   :  { %p2414_p3 = por %p2413_p2, %p2412_p1 }
   0xd   :  { %p2415_p4 = pnand %p2414_p3, %p2408_p0 }
   0xf   :  { %2418 = shalt.err (!%p2415_p4)
}
  0x10   :  { %s2529_s25 = smov 128   ;;  %s2530_s14 = smov 8  }
  0x11   :  { %63 = dma.hbm_to_vmem [thread:$0]  %s3005_s8, 512, %s58_s21, [#allocation6], %s2529_s25, %s2529_s25, %s2530_s14  }
  0x12   :  { %s2427_s28 = scalar_lea.vmem %s82_s23, 512  ;;  %p2432_p6 = scmp.lt.s32.totalorder %s82_s23, %s82_s23 }
  0x13   :  { %p2428_p5 = scmp.ne.s32.totalorder %s82_s23, %s2427_s28  ;;  %p2433_p7 = scmp.lt.s32.totalorder %s2427_s28, %s2427_s28 }
  0x15   :  { %p2434_p8 = por %p2433_p7, %p2432_p6 }
  0x17   :  { %p2435_p9 = pnand %p2434_p8, %p2428_p5 }
  0x19   :  { %2438 = shalt.err (!%p2435_p9)
}
  0x1a   :  { %87 = dma.hbm_to_vmem [thread:$0]  %s3007_s10, 512, %s82_s23, [#allocation9], %s2529_s25, %s2529_s25, %s2530_s14  }
  0x1b   :  { %s2531_s16 = smov [#allocation3]   ;;  %s2532_s18 = smov [#allocation7]  }
  0x1c   :  { %s33_s17 = sshll.u32 %s2531_s16, 4  ;;  %s69_s19 = sshll.u32 %s2532_s18, 4  ;;  %s34_s17 = int_to_ptr.vmem [resolvable:$true] %s33_s17  ;;  %s70_s19 = int_to_ptr.vmem [resolvable:$true] %s69_s19 }
  0x1d   :  { %s2447_s8 = scalar_lea.vmem %s34_s17, 512  ;;  %p2452_p11 = scmp.lt.s32.totalorder %s34_s17, %s34_s17 }
  0x1e   :  { %p2448_p10 = scmp.ne.s32.totalorder %s34_s17, %s2447_s8  ;;  %p2453_p12 = scmp.lt.s32.totalorder %s2447_s8, %s2447_s8 }
  0x20   :  { %p2454_p13 = por %p2453_p12, %p2452_p11 }
  0x22   :  { %p2455_p0 = pnand %p2454_p13, %p2448_p10 }
  0x24   :  { %2458 = shalt.err (!%p2455_p0)
}
  0x25   :  { %39 = dma.hbm_to_vmem [thread:$0]  %s2998_s1, 512, %s34_s17, [#allocation4], %s2529_s25, %s2529_s25, %s2530_s14  }
  0x26   :  { %s2467_s10 = scalar_lea.vmem %s70_s19, 512  ;;  %p2472_p2 = scmp.lt.s32.totalorder %s70_s19, %s70_s19 }
  0x27   :  { %p2468_p1 = scmp.ne.s32.totalorder %s70_s19, %s2467_s10  ;;  %p2473_p3 = scmp.lt.s32.totalorder %s2467_s10, %s2467_s10 }
  0x29   :  { %p2474_p4 = por %p2473_p3, %p2472_p2 }
  0x2b   :  { %p2475_p5 = pnand %p2474_p4, %p2468_p1 }
  0x2d   :  { %2478 = shalt.err (!%p2475_p5)
}
  0x2e   :  { %75 = dma.hbm_to_vmem [thread:$0]  %s3006_s9, 512, %s70_s19, [#allocation6], %s2529_s25, %s2529_s25, %s2530_s14  }
  0x2f   :  { %s2533_s24 = smov [#allocation10]   ;;  %s2534_s27 = smov [#allocation11]  }
  0x30   :  { %s93_s26 = sshll.u32 %s2533_s24, 4  ;;  %s105_s28 = sshll.u32 %s2534_s27, 4  ;;  %s94_s26 = int_to_ptr.vmem [resolvable:$true] %s93_s26  ;;  %s106_s28 = int_to_ptr.vmem [resolvable:$true] %s105_s28 }
  0x31   :  { %s2487_s1 = scalar_lea.vmem %s94_s26, 512  ;;  %p2492_p7 = scmp.lt.s32.totalorder %s94_s26, %s94_s26 }
  0x32   :  { %p2488_p6 = scmp.ne.s32.totalorder %s94_s26, %s2487_s1  ;;  %p2493_p8 = scmp.lt.s32.totalorder %s2487_s1, %s2487_s1 }
  0x34   :  { %p2494_p9 = por %p2493_p8, %p2492_p7 }
  0x36   :  { %p2495_p10 = pnand %p2494_p9, %p2488_p6 }
  0x38   :  { %2498 = shalt.err (!%p2495_p10)
}
  0x39   :  { %99 = dma.hbm_to_vmem [thread:$0]  %s3008_s11, 512, %s94_s26, [#allocation9], %s2529_s25, %s2529_s25, %s2530_s14  }
  0x3a   :  { %s2507_s9 = scalar_lea.vmem %s106_s28, 4096  ;;  %p2512_p12 = scmp.lt.s32.totalorder %s106_s28, %s106_s28 }
  0x3b   :  { %p2508_p11 = scmp.ne.s32.totalorder %s106_s28, %s2507_s9  ;;  %p2513_p13 = scmp.lt.s32.totalorder %s2507_s9, %s2507_s9 }
  0x3d   :  { %p2514_p0 = por %p2513_p13, %p2512_p12 }
  0x3f   :  { %p2515_p1 = pnand %p2514_p0, %p2508_p11 }
  0x41   :  { %2518 = shalt.err (!%p2515_p1)
}
  0x42   :  { %111 = dma.hbm_to_vmem [thread:$0]  %s3009_s12, 4096, %s106_s28, [#allocation12], %s2529_s25, %s2529_s25, %s2530_s14  }
  0x43   :  { %2519 = dma.done.wait [#allocation4], 512  }
  0x44   :  { %2520 = vsyncadd [#allocation4], 4294966784 }
  0x45   :  { %2521 = dma.done.wait [#allocation6], 1024  }
  0x46   :  { %2522 = vsyncadd [#allocation6], 4294966272 }
  0x47   :  { %2523 = dma.done.wait [#allocation9], 1024  }
  0x48   :  { %2524 = vsyncadd [#allocation9], 4294966272 }
  0x49   :  { %2525 = dma.done.wait [#allocation12], 4096  }
  0x4a   :  { %2526 = vsyncadd [#allocation12], 4294963200  ;;  %v2535_v1 = vmov 0   ;;  %v145_v2 = vld [vmem:[%s2997_s0 + $0x18] sm:$0xff]  ;;  %v143_v3 = vld [vmem:[%s2997_s0 + $0x8] sm:$0xff]  ;;  %vm178_vm0 = vcmask 261120   ;;  %v166_v7 = vlaneseq }
  0x4b   :  { %2298 = vset.pattern.permute.xlu1 %v2535_v1  ;;  %2297 = vset.pattern.permute.xlu0 %v2535_v1  ;;  %v144_v4 = vld [vmem:[%s2997_s0 + $0x10] sm:$0xff]  ;;  %v142_v5 = vld [vmem:[%s2997_s0] sm:$0xff]  ;;  %vm1147_vm3 = vcmask 64512   ;;  %vm2537_vm5 = vmmov 0   ;;  %vm1509_vm6 = vcmask 130048   ;;  %s2539_s29 = smov 32  }
  0x4c   :  { %163 = vperm.xlu0 %2297, %v145_v2   ;;  %153 = vperm.xlu1 %2298, %v143_v3   ;;  %v138_v6 = vld [vmem:[#allocation3] sm:$0xff]  ;;  %v2674_v8 = vshrl.u32 %v166_v7, 7  ;;  %v2686_v20 = vld [vmem:[#allocation3 + $0x8] sm:$0xff]  ;;  %v2688_v21 = vld [vmem:[#allocation3 + $0x10] sm:$0xff]  ;;  %s2540_s19 = smov 96   ;;  %vm1686_vm7 = vcmask 523264  }
  0x4d   :  { %2132 = vmatprep.mubr.msk.f32.mxu0 %vm178_vm0, %v138_v6  ;;  %v2682_v10 = vld [vmem:[%s3002_s5] sm:$0xff]  ;;  %v347_v58 = vld [vmem:[#allocation5 + $0x10] sm:$0xff]  ;;  %v346_v59 = vld [vmem:[#allocation5 + $0x8] sm:$0xff]  ;;  %vm1688_vm8 = vcmask 785408   ;;  %vm1729_vm9 = vcmask 1040384   ;;  %vm1955_vm10 = vcmask 1041408  }
  0x4e   :  { %v2677_v9 = vsub.s32 0, %v2674_v8  ;;  %v2694_v22 = vld [vmem:[#allocation3 + $0x18] sm:$0xff]  ;;  %v2700_v23 = vsub.s32 1, %v2674_v8  ;;  %v345_v60 = vld [vmem:[#allocation5] sm:$0xff]  ;;  %vm1967_vm11 = vcmask 1024  }
  0x4f   :  { %v348_v57 = vld [vmem:[#allocation5 + $0x18] sm:$0xff] }
  0x50   :  { %158 = vperm.xlu0 %2297, %v144_v4   ;;  %148 = vperm.xlu1 %2298, %v142_v5   ;;  %v169_v11 = vrot.slane %v2682_v10, %v2677_v9  ;;  %v177_v24 = vrot.slane %v2682_v10, %v2700_v23 }
  0x51   :  { %2138 = vmatprep.subr.mxu1 %v348_v57 }
  0x52   :  { %2139 = vmatpush3.msra.mxu1 %v348_v57 }
  0x53   :  { %2140 = vmatprep.subr.mxu1 %v347_v58 }
  0x54   :  { %2141 = vmatpush3.msra.mxu1 %v347_v58 }
  0x55   :  { %2142 = vmatprep.subr.mxu1 %v346_v59 }
  0x56   :  { %2143 = vmatpush3.msra.mxu1 %v346_v59 }
  0x57   :  { %2144 = vmatprep.subr.mxu1 %v345_v60 }
  0x58   :  { %2145 = vmatpush3.msra.mxu1 %v345_v60 }
  0xc7   :  { %v164_v12 = vpop.permute.xlu0 %163  ;;  %v154_v13 = vpop.permute.xlu1 %153 }
  0xc8   :  { %v173_v14 = vmul.f32 %v169_v11, %v164_v12  ;;  %v171_v18 = vmul.f32 %v169_v11, %v154_v13  ;;  %v2713_v13 = vsub.s32 2, %v2674_v8 }
  0xca   :  { %2124 = vmatprep.subr.mxu0 %v173_v14 }
  0xcb   :  { %v159_v15 = vpop.permute.xlu0 %158  ;;  %2125 = vmatpush3.msra.mxu0 %v173_v14  ;;  %v149_v17 = vpop.permute.xlu1 %148 }
  0xcc   :  { %v172_v16 = vmul.f32 %v169_v11, %v159_v15  ;;  %v170_v19 = vmul.f32 %v169_v11, %v149_v17  ;;  %v332_v15 = vrot.slane %v2682_v10, %v2713_v13 }
  0xce   :  { %2126 = vmatprep.subr.mxu0 %v172_v16 }
  0xcf   :  { %2127 = vmatpush3.msra.mxu0 %v172_v16  ;;  %v2718_v16 = vsub.s32 3, %v2674_v8 }
  0xd0   :  { %2128 = vmatprep.subr.mxu0 %v171_v18 }
  0xd1   :  { %2129 = vmatpush3.msra.mxu0 %v171_v18 }
  0xd2   :  { %2130 = vmatprep.subr.mxu0 %v170_v19 }
  0xd3   :  { %2131 = vmatpush3.msra.mxu0 %v170_v19 }
  0xd4   :  { %2133 = vmatmul.mubr.msk.f32.vlgmr.msra.gmra.mxu0 %vm178_vm0, %v2686_v20 }
  0xd5   :  { %2135 = vmatprep.mubr.msk.f32.mxu0 %vm178_vm0, %v2688_v21 }
  0xd8   :  { %2136 = vmatmul.mubr.msk.f32.gmra.mxu0 %vm178_vm0, %v2694_v22 }
  0xd9   :  { %2160 = vmatprep.mubr.msk.f32.mxu0 %vm178_vm0, %v138_v6 }
 0x194   :  { %v2134_v25 = vpop.f32.mrf.mxu0 }
 0x195   :  { %v263_v26 = vadd.f32 %v2134_v25, %v177_v24 }
 0x196   :  { %v257_v27 = vpop.f32.mrf.mxu0 }
 0x197   :  { %v258_v28 = vadd.f32 %v257_v27, %v177_v24  ;;  %v279_v29 = vsel %vm178_vm0, %v263_v26, 0.0 }
 0x198   :  { %280 = vadd.xlane.f32.xlu1 %v279_v29  ;;  %v2137_v30 = vpop.f32.mrf.mxu0 }
 0x199   :  { %v276_v31 = vsel %vm178_vm0, %v258_v28, 0.0  ;;  %v273_v34 = vadd.f32 %v2137_v30, %v177_v24 }
 0x19a   :  { %v267_v32 = vpop.f32.mrf.mxu0  ;;  %277 = vadd.xlane.f32.xlu0 %v276_v31 }
 0x19b   :  { %v268_v33 = vadd.f32 %v267_v32, %v177_v24  ;;  %v285_v36 = vsel %vm178_vm0, %v273_v34, 0.0  ;;  %v340_v24 = vrot.slane %v2682_v10, %v2718_v16 }
 0x19d   :  { %v282_v35 = vsel %vm178_vm0, %v268_v33, 0.0 }
 0x19e   :  { %283 = vadd.xlane.f32.xlu0 %v282_v35 }
 0x1a2   :  { %286 = vadd.xlane.f32.xlu0 %v285_v36 }
 0x221   :  { %v281_v37 = vpop.xlane.xlu1 %280 }
 0x222   :  { %v290_v38 = vmul.f32 0.03125, %v281_v37 }
 0x223   :  { %v278_v39 = vpop.xlane.xlu0 %277 }
 0x224   :  { %v294_v40 = vsub.f32 %v263_v26, %v290_v38  ;;  %v289_v41 = vmul.f32 0.03125, %v278_v39 }
 0x226   :  { %v293_v42 = vsub.f32 %v258_v28, %v289_v41  ;;  %v298_v43 = vmul.f32 %v294_v40, %v294_v40  ;;  %v2745_v41 = vsub.s32 4, %v2674_v8 }
 0x227   :  { %v284_v44 = vpop.xlane.xlu0 %283 }
 0x228   :  { %v291_v45 = vmul.f32 0.03125, %v284_v44  ;;  %v304_v46 = vsel %vm178_vm0, %v298_v43, 0.0  ;;  %v297_v47 = vmul.f32 %v293_v42, %v293_v42 }
 0x229   :  { %305 = vadd.xlane.f32.xlu0 %v304_v46 }
 0x22a   :  { %v295_v48 = vsub.f32 %v268_v33, %v291_v45  ;;  %v301_v49 = vsel %vm178_vm0, %v297_v47, 0.0 }
 0x22b   :  { %302 = vadd.xlane.f32.xlu1 %v301_v49  ;;  %v287_v50 = vpop.xlane.xlu0 %286 }
 0x22c   :  { %v292_v51 = vmul.f32 0.03125, %v287_v50  ;;  %v299_v52 = vmul.f32 %v295_v48, %v295_v48 }
 0x22e   :  { %v296_v53 = vsub.f32 %v273_v34, %v292_v51  ;;  %v307_v54 = vsel %vm178_vm0, %v299_v52, 0.0 }
 0x22f   :  { %308 = vadd.xlane.f32.xlu1 %v307_v54 }
 0x230   :  { %v300_v55 = vmul.f32 %v296_v53, %v296_v53 }
 0x232   :  { %v310_v56 = vsel %vm178_vm0, %v300_v55, 0.0 }
 0x233   :  { %311 = vadd.xlane.f32.xlu0 %v310_v56 }
 0x2b2   :  { %v306_v61 = vpop.xlane.xlu0 %305 }
 0x2b3   :  { %v314_v62 = vmul.f32 0.03125, %v306_v61 }
 0x2b4   :  { %v303_v63 = vpop.xlane.xlu1 %302 }
 0x2b5   :  { %v318_v0 = vadd.f32 1e-05, %v314_v62  ;;  %v313_v1 = vmul.f32 0.03125, %v303_v63 }
 0x2b7   :  { %2329 = vrsqrt.f32 %v318_v0  ;;  %v317_v2 = vadd.f32 1e-05, %v313_v1 }
 0x2b8   :  { %v309_v3 = vpop.xlane.xlu1 %308 }
 0x2b9   :  { %2331 = vrsqrt.f32 %v317_v2  ;;  %v315_v4 = vmul.f32 0.03125, %v309_v3 }
 0x2bb   :  { %v319_v5 = vadd.f32 1e-05, %v315_v4 }
 0x2bc   :  { %v312_v6 = vpop.xlane.xlu0 %311 }
 0x2bd   :  { %2333 = vrsqrt.f32 %v319_v5  ;;  %v316_v11 = vmul.f32 0.03125, %v312_v6 }
 0x2bf   :  { %v320_v12 = vadd.f32 1e-05, %v316_v11 }
 0x2c1   :  { %2335 = vrsqrt.f32 %v320_v12  ;;  %v612_v12 = vld [vmem:[#allocation8 + $0x18] sm:$0xff] }
 0x2c2   :  { %2166 = vmatprep.subr.mxu1 %v612_v12 }
 0x2c4   :  { %v2330_v14 = vpop.eup %2329 }
 0x2c5   :  { %v326_v17 = vmul.f32 %v2330_v14, %v294_v40  ;;  %v611_v14 = vld [vmem:[#allocation8 + $0x10] sm:$0xff] }
 0x2c6   :  { %v2332_v18 = vpop.eup %2331 }
 0x2c7   :  { %v325_v19 = vmul.f32 %v2332_v18, %v293_v42  ;;  %v334_v25 = vmul.f32 %v332_v15, %v326_v17  ;;  %v449_v42 = vrot.slane %v2682_v10, %v2745_v41  ;;  %v609_v17 = vld [vmem:[#allocation8] sm:$0xff] }
 0x2c9   :  { %v333_v26 = vmul.f32 %v332_v15, %v325_v19  ;;  %v2724_v30 = vadd.f32 %v340_v24, %v334_v25 }
 0x2ca   :  { %v2334_v27 = vpop.eup %2333 }
 0x2cb   :  { %v2722_v28 = vadd.f32 %v340_v24, %v333_v26  ;;  %v327_v29 = vmul.f32 %v2334_v27, %v295_v48 }
 0x2cd   :  { %2146 = vmatprep.mubr.msk.f32.mxu1 %vm178_vm0, %v2722_v28  ;;  %v335_v31 = vmul.f32 %v332_v15, %v327_v29 }
 0x2ce   :  { %v2336_v32 = vpop.eup %2335  ;;  %2147 = vmatmul.mubr.msk.f32.vlgmr.msra.gmra.mxu1 %vm178_vm0, %v2724_v30 }
 0x2cf   :  { %v2730_v33 = vadd.f32 %v340_v24, %v335_v31  ;;  %v328_v34 = vmul.f32 %v2336_v32, %v296_v53  ;;  %2167 = vmatpush3.msra.mxu1 %v612_v12 }
 0x2d0   :  { %2168 = vmatprep.subr.mxu1 %v611_v14 }
 0x2d1   :  { %2149 = vmatprep.mubr.msk.f32.mxu1 %vm178_vm0, %v2730_v33  ;;  %v336_v35 = vmul.f32 %v332_v15, %v328_v34  ;;  %v610_v15 = vld [vmem:[#allocation8 + $0x8] sm:$0xff]  ;;  %2169 = vmatpush3.msra.mxu1 %v611_v14 }
 0x2d2   :  { %2170 = vmatprep.subr.mxu1 %v610_v15 }
 0x2d3   :  { %v2734_v36 = vadd.f32 %v340_v24, %v336_v35  ;;  %2171 = vmatpush3.msra.mxu1 %v610_v15 }
 0x2d4   :  { %2172 = vmatprep.subr.mxu1 %v609_v17 }
 0x2d5   :  { %2150 = vmatmul.mubr.msk.f32.gmra.mxu1 %vm178_vm0, %v2734_v36 }
 0x2d6   :  { %2173 = vmatpush3.msra.mxu1 %v609_v17 }
 0x38e   :  { %v2148_v37 = vpop.f32.mrf.mxu1 }
 0x390   :  { %v427_v38 = vpop.f32.mrf.mxu1 }
 0x395   :  { %v2151_v39 = vpop.f32.mrf.mxu1 }
 0x396   :  { %2152 = vmatprep.subr.mxu0 %v2151_v39 }
 0x397   :  { %v437_v40 = vpop.f32.mrf.mxu1  ;;  %2153 = vmatpush3.msra.mxu0 %v2151_v39  ;;  %v2761_v39 = vsub.s32 6, %v2674_v8 }
 0x398   :  { %2154 = vmatprep.subr.mxu0 %v437_v40 }
 0x399   :  { %2155 = vmatpush3.msra.mxu0 %v437_v40 }
 0x39a   :  { %2156 = vmatprep.subr.mxu0 %v2148_v37 }
 0x39b   :  { %2157 = vmatpush3.msra.mxu0 %v2148_v37 }
 0x39c   :  { %2158 = vmatprep.subr.mxu0 %v427_v38 }
 0x39d   :  { %2159 = vmatpush3.msra.mxu0 %v427_v38  ;;  %v2758_v38 = vsub.s32 5, %v2674_v8 }
 0x39e   :  { %2161 = vmatmul.mubr.msk.f32.vlgmr.msra.gmra.mxu0 %vm178_vm0, %v2686_v20 }
 0x39f   :  { %2163 = vmatprep.mubr.msk.f32.mxu0 %vm178_vm0, %v2688_v21  ;;  %v590_v40 = vrot.slane %v2682_v10, %v2758_v38 }
 0x3a2   :  { %2164 = vmatmul.mubr.msk.f32.gmra.mxu0 %vm178_vm0, %v2694_v22 }
 0x45e   :  { %v2162_v43 = vpop.f32.mrf.mxu0 }
 0x45f   :  { %v522_v44 = vadd.f32 %v2162_v43, %v449_v42 }
 0x460   :  { %v516_v45 = vpop.f32.mrf.mxu0 }
 0x461   :  { %v517_v46 = vadd.f32 %v516_v45, %v449_v42  ;;  %v538_v47 = vsel %vm178_vm0, %v522_v44, 0.0  ;;  %v598_v45 = vrot.slane %v2682_v10, %v2761_v39 }
 0x462   :  { %539 = vadd.xlane.f32.xlu0 %v538_v47  ;;  %v2165_v20 = vpop.f32.mrf.mxu0 }
 0x463   :  { %v532_v48 = vadd.f32 %v2165_v20, %v449_v42  ;;  %v535_v21 = vsel %vm178_vm0, %v517_v46, 0.0 }
 0x464   :  { %v526_v49 = vpop.f32.mrf.mxu0  ;;  %536 = vadd.xlane.f32.xlu1 %v535_v21 }
 0x465   :  { %v527_v22 = vadd.f32 %v526_v49, %v449_v42  ;;  %v544_v50 = vsel %vm178_vm0, %v532_v48, 0.0 }
 0x466   :  { %545 = vadd.xlane.f32.xlu0 %v544_v50 }
 0x467   :  { %v541_v51 = vsel %vm178_vm0, %v527_v22, 0.0 }
 0x468   :  { %542 = vadd.xlane.f32.xlu1 %v541_v51 }
 0x4eb   :  { %v540_v52 = vpop.xlane.xlu0 %539 }
 0x4ec   :  { %v548_v53 = vmul.f32 0.03125, %v540_v52 }
 0x4ed   :  { %v537_v54 = vpop.xlane.xlu1 %536 }
 0x4ee   :  { %v552_v55 = vsub.f32 %v522_v44, %v548_v53  ;;  %v547_v56 = vmul.f32 0.03125, %v537_v54 }
 0x4ef   :  { %v546_v57 = vpop.xlane.xlu0 %545 }
 0x4f0   :  { %v551_v58 = vsub.f32 %v517_v46, %v547_v56  ;;  %v550_v59 = vmul.f32 0.03125, %v546_v57  ;;  %v556_v60 = vmul.f32 %v552_v55, %v552_v55 }
 0x4f1   :  { %v543_v61 = vpop.xlane.xlu1 %542 }
 0x4f2   :  { %v554_v62 = vsub.f32 %v532_v48, %v550_v59  ;;  %v549_v63 = vmul.f32 0.03125, %v543_v61  ;;  %v562_v0 = vsel %vm178_vm0, %v556_v60, 0.0  ;;  %v555_v1 = vmul.f32 %v551_v58, %v551_v58 }
 0x4f3   :  { %563 = vadd.xlane.f32.xlu0 %v562_v0 }
 0x4f4   :  { %v553_v2 = vsub.f32 %v527_v22, %v549_v63  ;;  %v559_v3 = vsel %vm178_vm0, %v555_v1, 0.0  ;;  %v558_v4 = vmul.f32 %v554_v62, %v554_v62 }
 0x4f5   :  { %560 = vadd.xlane.f32.xlu1 %v559_v3 }
 0x4f6   :  { %v568_v5 = vsel %vm178_vm0, %v558_v4, 0.0  ;;  %v557_v6 = vmul.f32 %v553_v2, %v553_v2 }
 0x4f7   :  { %569 = vadd.xlane.f32.xlu0 %v568_v5 }
 0x4f8   :  { %v565_v11 = vsel %vm178_vm0, %v557_v6, 0.0 }
 0x4f9   :  { %566 = vadd.xlane.f32.xlu1 %v565_v11 }
 0x57c   :  { %v564_v18 = vpop.xlane.xlu0 %563 }
 0x57d   :  { %v572_v19 = vmul.f32 0.03125, %v564_v18 }
 0x57e   :  { %v561_v24 = vpop.xlane.xlu1 %560 }
 0x57f   :  { %v576_v25 = vadd.f32 1e-05, %v572_v19  ;;  %v571_v26 = vmul.f32 0.03125, %v561_v24 }
 0x580   :  { %v570_v27 = vpop.xlane.xlu0 %569 }
 0x581   :  { %2337 = vrsqrt.f32 %v576_v25  ;;  %v575_v29 = vadd.f32 1e-05, %v571_v26  ;;  %v574_v31 = vmul.f32 0.03125, %v570_v27 }
 0x582   :  { %v567_v32 = vpop.xlane.xlu1 %566 }
 0x583   :  { %2339 = vrsqrt.f32 %v575_v29  ;;  %v578_v34 = vadd.f32 1e-05, %v574_v31  ;;  %v573_v35 = vmul.f32 0.03125, %v567_v32 }
 0x585   :  { %2341 = vrsqrt.f32 %v578_v34  ;;  %v577_v37 = vadd.f32 1e-05, %v573_v35 }
 0x587   :  { %2343 = vrsqrt.f32 %v577_v37 }
 0x58e   :  { %v2338_v42 = vpop.eup %2337 }
 0x58f   :  { %v584_v43 = vmul.f32 %v2338_v42, %v552_v55 }
 0x590   :  { %v2340_v44 = vpop.eup %2339 }
 0x591   :  { %v592_v46 = vmul.f32 %v590_v40, %v584_v43  ;;  %v583_v47 = vmul.f32 %v2340_v44, %v551_v58 }
 0x592   :  { %v2342_v20 = vpop.eup %2341 }
 0x593   :  { %v591_v48 = vmul.f32 %v590_v40, %v583_v47  ;;  %v586_v21 = vmul.f32 %v2342_v20, %v554_v62  ;;  %v600_v22 = vadd.f32 %v598_v45, %v592_v46 }
 0x594   :  { %v2344_v49 = vpop.eup %2343 }
 0x595   :  { %v599_v50 = vadd.f32 %v598_v45, %v591_v48  ;;  %v585_v51 = vmul.f32 %v2344_v49, %v553_v2  ;;  %v594_v52 = vmul.f32 %v590_v40, %v586_v21  ;;  %v2771_v55 = vadd.f32 %v600_v22, %v2724_v30 }
 0x597   :  { %v2768_v53 = vadd.f32 %v599_v50, %v2722_v28  ;;  %v593_v54 = vmul.f32 %v590_v40, %v585_v51  ;;  %v602_v56 = vadd.f32 %v598_v45, %v594_v52  ;;  %v2790_v28 = vld [vmem:[%s3003_s6] sm:$0xff] }
 0x598   :  { %v616_v30 = vrot.slane %v2790_v28, %v2677_v9  ;;  %v762_v47 = vrot.slane %v2790_v28, %v2700_v23  ;;  %v770_v21 = vrot.slane %v2790_v28, %v2713_v13 }
 0x599   :  { %2174 = vmatprep.mubr.msk.f32.mxu1 %vm178_vm0, %v2768_v53  ;;  %v601_v57 = vadd.f32 %v598_v45, %v593_v54  ;;  %v2781_v59 = vadd.f32 %v602_v56, %v2734_v36 }
 0x59a   :  { %2175 = vmatmul.mubr.msk.f32.vlgmr.msra.gmra.mxu1 %vm178_vm0, %v2771_v55 }
 0x59b   :  { %v2778_v58 = vadd.f32 %v601_v57, %v2730_v33 }
 0x59d   :  { %2177 = vmatprep.mubr.msk.f32.mxu1 %vm178_vm0, %v2778_v58 }
 0x59e   :  { %2178 = vmatmul.mubr.msk.f32.gmra.mxu1 %vm178_vm0, %v2781_v59 }
 0x65a   :  { %v2176_v60 = vpop.f32.mrf.mxu1 }
 0x65b   :  { %v701_v33 = vadd.f32 %v2176_v60, %v616_v30 }
 0x65c   :  { %v695_v61 = vpop.f32.mrf.mxu1 }
 0x65d   :  { %v696_v62 = vadd.f32 %v695_v61, %v616_v30  ;;  %716 = vadd.xlane.f32.xlu0 %v701_v33 }
 0x65e   :  { %v2179_v36 = vpop.f32.mrf.mxu1 }
 0x65f   :  { %v711_v63 = vadd.f32 %v2179_v36, %v616_v30  ;;  %714 = vadd.xlane.f32.xlu1 %v696_v62 }
 0x660   :  { %v705_v0 = vpop.f32.mrf.mxu1 }
 0x661   :  { %v706_v1 = vadd.f32 %v705_v0, %v616_v30  ;;  %720 = vadd.xlane.f32.xlu0 %v711_v63 }
 0x663   :  { %718 = vadd.xlane.f32.xlu1 %v706_v1 }
 0x6e6   :  { %v717_v2 = vpop.xlane.xlu0 %716 }
 0x6e7   :  { %v724_v3 = vmul.f32 0.0078125, %v717_v2 }
 0x6e8   :  { %v715_v4 = vpop.xlane.xlu1 %714 }
 0x6e9   :  { %v728_v5 = vsub.f32 %v701_v33, %v724_v3  ;;  %v723_v6 = vmul.f32 0.0078125, %v715_v4 }
 0x6ea   :  { %v721_v11 = vpop.xlane.xlu0 %720 }
 0x6eb   :  { %v727_v12 = vsub.f32 %v696_v62, %v723_v6  ;;  %v726_v14 = vmul.f32 0.0078125, %v721_v11  ;;  %v732_v15 = vmul.f32 %v728_v5, %v728_v5 }
 0x6ec   :  { %v719_v17 = vpop.xlane.xlu1 %718 }
 0x6ed   :  { %v730_v18 = vsub.f32 %v711_v63, %v726_v14  ;;  %v725_v19 = vmul.f32 0.0078125, %v719_v17  ;;  %737 = vadd.xlane.f32.xlu0 %v732_v15  ;;  %v731_v24 = vmul.f32 %v727_v12, %v727_v12  ;;  %v782_v63 = vrot.slane %v2790_v28, %v2718_v16 }
 0x6ef   :  { %v729_v25 = vsub.f32 %v706_v1, %v725_v19  ;;  %735 = vadd.xlane.f32.xlu1 %v731_v24  ;;  %v734_v26 = vmul.f32 %v730_v18, %v730_v18 }
 0x6f1   :  { %741 = vadd.xlane.f32.xlu0 %v734_v26  ;;  %v733_v27 = vmul.f32 %v729_v25, %v729_v25 }
 0x6f3   :  { %739 = vadd.xlane.f32.xlu1 %v733_v27 }
 0x776   :  { %v738_v29 = vpop.xlane.xlu0 %737 }
 0x777   :  { %v744_v31 = vmul.f32 0.0078125, %v738_v29 }
 0x778   :  { %v736_v32 = vpop.xlane.xlu1 %735 }
 0x779   :  { %v748_v34 = vadd.f32 1e-05, %v744_v31  ;;  %v743_v35 = vmul.f32 0.0078125, %v736_v32 }
 0x77a   :  { %v742_v37 = vpop.xlane.xlu0 %741 }
 0x77b   :  { %2345 = vrsqrt.f32 %v748_v34  ;;  %v747_v40 = vadd.f32 1e-05, %v743_v35  ;;  %v746_v42 = vmul.f32 0.0078125, %v742_v37 }
 0x77c   :  { %v740_v43 = vpop.xlane.xlu1 %739 }
 0x77d   :  { %2347 = vrsqrt.f32 %v747_v40  ;;  %v750_v44 = vadd.f32 1e-05, %v746_v42  ;;  %v745_v45 = vmul.f32 0.0078125, %v740_v43 }
 0x77f   :  { %2349 = vrsqrt.f32 %v750_v44  ;;  %v749_v46 = vadd.f32 1e-05, %v745_v45 }
 0x781   :  { %2351 = vrsqrt.f32 %v749_v46 }
 0x788   :  { %v2346_v20 = vpop.eup %2345 }
 0x789   :  { %v756_v48 = vmul.f32 %v2346_v20, %v728_v5 }
 0x78a   :  { %v2348_v49 = vpop.eup %2347 }
 0x78b   :  { %v764_v22 = vmul.f32 %v762_v47, %v756_v48  ;;  %v755_v50 = vmul.f32 %v2348_v49, %v727_v12  ;;  %v607_v12 = vld [vmem:[%s3000_s3] sm:$0xff] }
 0x78c   :  { %v2350_v51 = vpop.eup %2349  ;;  %2199 = vmatprep.mubr.msk.f32.mxu1 %vm178_vm0, %v607_v12  ;;  %2188 = vmatprep.mubr.msk.f32.mxu0 %vm178_vm0, %v607_v12 }
 0x78d   :  { %v763_v52 = vmul.f32 %v762_v47, %v755_v50  ;;  %v758_v54 = vmul.f32 %v2350_v51, %v730_v18  ;;  %v772_v56 = vadd.f32 %v770_v21, %v764_v22  ;;  %v608_v51 = vld [vmem:[%s3000_s3 + $0x8] sm:$0xff] }
 0x78e   :  { %v2352_v57 = vpop.eup %2351 }
 0x78f   :  { %v766_v30 = vmul.f32 %v762_v47, %v758_v54  ;;  %v757_v60 = vmul.f32 %v2352_v57, %v729_v25  ;;  %2353 = vtanh.f32 %v772_v56  ;;  %v771_v33 = vadd.f32 %v770_v21, %v763_v52  ;;  %v995_v54 = vld [vmem:[#allocation7 + $0x18] sm:$0xff] }
 0x791   :  { %v765_v61 = vmul.f32 %v762_v47, %v757_v60  ;;  %2355 = vtanh.f32 %v771_v33  ;;  %v774_v62 = vadd.f32 %v770_v21, %v766_v30  ;;  %v994_v33 = vld [vmem:[#allocation7 + $0x10] sm:$0xff] }
 0x793   :  { %2357 = vtanh.f32 %v774_v62  ;;  %v773_v36 = vadd.f32 %v770_v21, %v765_v61  ;;  %v993_v61 = vld [vmem:[#allocation7 + $0x8] sm:$0xff]  ;;  %v992_v62 = vld [vmem:[#allocation7] sm:$0xff] }
 0x795   :  { %2359 = vtanh.f32 %v773_v36 }
 0x79c   :  { %v2354_v0 = vpop.eup %2353 }
 0x79d   :  { %v784_v1 = vmul.f32 %v2354_v0, %v782_v63 }
 0x79e   :  { %v2356_v2 = vpop.eup %2355 }
 0x79f   :  { %789 = vadd.xlane.f32.xlu0 %v784_v1  ;;  %v783_v3 = vmul.f32 %v2356_v2, %v782_v63 }
 0x7a0   :  { %v2358_v4 = vpop.eup %2357 }
 0x7a1   :  { %787 = vadd.xlane.f32.xlu1 %v783_v3  ;;  %v786_v5 = vmul.f32 %v2358_v4, %v782_v63 }
 0x7a2   :  { %v2360_v6 = vpop.eup %2359 }
 0x7a3   :  { %793 = vadd.xlane.f32.xlu0 %v786_v5  ;;  %v785_v11 = vmul.f32 %v2360_v6, %v782_v63  ;;  %v2536_v6 = vmov 0.0  }
 0x7a5   :  { %791 = vadd.xlane.f32.xlu1 %v785_v11  ;;  %v2820_v11 = vld [vmem:[%s3002_s5 + $0x8] sm:$0xf] }
 0x828   :  { %v790_v14 = vpop.xlane.xlu0 %789 }
 0x82a   :  { %v788_v15 = vpop.xlane.xlu1 %787 }
 0x82b   :  { %v795_v19 = vmax.f32 %v788_v15, %v790_v14 }
 0x82c   :  { %v794_v17 = vpop.xlane.xlu0 %793 }
 0x82e   :  { %v792_v18 = vpop.xlane.xlu1 %791 }
 0x82f   :  { %v796_v24 = vmax.f32 %v792_v18, %v794_v17 }
 0x831   :  { %v797_v25 = vmax.f32 %v795_v19, %v796_v24 }
 0x833   :  { %v798_v26 = vrot.slane %v797_v25, 4 }
 0x835   :  { %v799_v27 = vmax.f32 %v797_v25, %v798_v26 }
 0x837   :  { %v800_v29 = vrot.slane %v799_v27, 2 }
 0x839   :  { %v801_v31 = vmax.f32 %v799_v27, %v800_v29 }
 0x83b   :  { %v802_v32 = vrot.slane %v801_v31, 1 }
 0x83d   :  { %v803_v34 = vmax.f32 %v801_v31, %v802_v32  ;;  %v1104_v32 = vand.u32 127, %v166_v7 }
 0x83f   :  { %v806_v35 = vsub.f32 %v792_v18, %v803_v34  ;;  %v807_v37 = vsub.f32 %v794_v17, %v803_v34  ;;  %v805_v40 = vsub.f32 %v790_v14, %v803_v34  ;;  %v804_v43 = vsub.f32 %v788_v15, %v803_v34 }
 0x840   :  { %v1092_v14 = vrot.slane %v2820_v11, %v2700_v23  ;;  %v1080_v15 = vrot.slane %v2820_v11, %v2677_v9  ;;  %v1107_v34 = vsub.s32 %v1104_v32, %v2674_v8 }
 0x841   :  { %v812_v42 = vmul.f32 1.442695, %v806_v35  ;;  %v814_v44 = vmul.f32 1.442695, %v807_v37  ;;  %v810_v45 = vmul.f32 1.442695, %v805_v40 }
 0x842   :  { %v808_v46 = vmul.f32 1.442695, %v804_v43 }
 0x843   :  { %2361 = vpow2.f32 %v812_v42  ;;  %v1141_v42 = vld [vmem:[%s2999_s2] sm:$0xff] }
 0x844   :  { %2363 = vpow2.f32 %v814_v44  ;;  %vm1142_vm2 = vcmp.gt.f32.partialorder %v1141_v42, 0.0 }
 0x845   :  { %2365 = vpow2.f32 %v810_v45 }
 0x846   :  { %2367 = vpow2.f32 %v808_v46 }
 0x850   :  { %v2362_v47 = vpop.eup %2361 }
 0x851   :  { %v2364_v20 = vpop.eup %2363  ;;  %v818_v49 = vmul.f32 %v2362_v47, %v2778_v58 }
 0x852   :  { %2191 = vmatprep.subr.mxu1 %v2364_v20  ;;  %v819_v48 = vmul.f32 %v2364_v20, %v2781_v59  ;;  %v2366_v21 = vpop.eup %2365 }
 0x853   :  { %2192 = vmatpush3.msra.mxu1 %v2364_v20  ;;  %v2368_v22 = vpop.eup %2367  ;;  %v817_v50 = vmul.f32 %v2366_v21, %v2771_v55 }
 0x854   :  { %2180 = vmatprep.subr.mxu0 %v819_v48  ;;  %2193 = vmatprep.subr.mxu1 %v2362_v47  ;;  %v816_v52 = vmul.f32 %v2368_v22, %v2768_v53 }
 0x855   :  { %2181 = vmatpush3.msra.mxu0 %v819_v48  ;;  %2194 = vmatpush3.msra.mxu1 %v2362_v47 }
 0x856   :  { %2182 = vmatprep.subr.mxu0 %v818_v49  ;;  %2195 = vmatprep.subr.mxu1 %v2366_v21 }
 0x857   :  { %2183 = vmatpush3.msra.mxu0 %v818_v49  ;;  %2196 = vmatpush3.msra.mxu1 %v2366_v21 }
 0x858   :  { %2184 = vmatprep.subr.mxu0 %v817_v50  ;;  %2197 = vmatprep.subr.mxu1 %v2368_v22 }
 0x859   :  { %2185 = vmatpush3.msra.mxu0 %v817_v50  ;;  %2198 = vmatpush3.msra.mxu1 %v2368_v22 }
 0x85a   :  { %2186 = vmatprep.subr.mxu0 %v816_v52  ;;  %2200 = vmatmul.mubr.msk.f32.vlgmr.msra.gmra.mxu1 %vm178_vm0, %v608_v51 }
 0x85b   :  { %2187 = vmatpush3.msra.mxu0 %v816_v52  ;;  %2213 = vmatprep.subr.mxu1 %v2536_v6 }
 0x85c   :  { %2189 = vmatmul.mubr.msk.f32.vlgmr.msra.gmra.mxu0 %vm178_vm0, %v608_v51  ;;  %2202 = vmatprep.subr.mxu0 %v995_v54 }
 0x85d   :  { %2203 = vmatpush3.msra.mxu0 %v995_v54  ;;  %2215 = vmatprep.mubr.msk.f32.mxu1 %vm2537_vm5, %v2536_v6 }
 0x85e   :  { %2204 = vmatprep.subr.mxu0 %v994_v33 }
 0x85f   :  { %2205 = vmatpush3.msra.mxu0 %v994_v33 }
 0x860   :  { %2206 = vmatprep.subr.mxu0 %v993_v61 }
 0x861   :  { %2207 = vmatpush3.msra.mxu0 %v993_v61 }
 0x862   :  { %2208 = vmatprep.subr.mxu0 %v992_v62 }
 0x863   :  { %2209 = vmatpush3.msra.mxu0 %v992_v62 }
 0x91a   :  { %v2201_v56 = vpop.f32.mrf.mxu1 }
 0x91b   :  { %v977_v57 = vmax.f32 %v2201_v56, 1e-20 }
 0x91c   :  { %v967_v30 = vpop.f32.mrf.mxu1  ;;  %v2190_v0 = vpop.f32.mrf.mxu0 }
 0x91d   :  { %2369 = vrcp.f32 %v977_v57  ;;  %v976_v60 = vmax.f32 %v967_v30, 1e-20 }
 0x91e   :  { %v892_v2 = vpop.f32.mrf.mxu0 }
 0x91f   :  { %2371 = vrcp.f32 %v976_v60 }
 0x92a   :  { %v2370_v36 = vpop.eup %2369 }
 0x92b   :  { %987 = vperm.xlu0 %2297, %v2370_v36  }
 0x92c   :  { %v2372_v63 = vpop.eup %2371 }
 0x92d   :  { %982 = vperm.xlu1 %2298, %v2372_v63  }
 0x9a6   :  { %v988_v1 = vpop.permute.xlu0 %987 }
 0x9a7   :  { %v991_v5 = vmul.f32 %v2190_v0, %v988_v1 }
 0x9a8   :  { %v983_v3 = vpop.permute.xlu1 %982 }
 0x9a9   :  { %v990_v4 = vmul.f32 %v983_v3, %v892_v2 }
 0x9ab   :  { %2210 = vmatprep.mubr.msk.f32.mxu0 %vm178_vm0, %v990_v4 }
 0x9ac   :  { %2211 = vmatmul.mubr.msk.f32.vlgmr.msra.gmra.mxu0 %vm178_vm0, %v991_v5  ;;  %v1172_v5 = vsub.s32 7, %v2674_v8 }
 0xa6c   :  { %v2822_v12 = vpop.f32.mrf.mxu0 }
 0xa6d   :  { %v1094_v26 = vmul.f32 %v2822_v12, %v1092_v14  ;;  %v1082_v27 = vmul.f32 %v2822_v12, %v1080_v15 }
 0xa6e   :  { %v1068_v17 = vpop.f32.mrf.mxu0 }
 0xa6f   :  { %2214 = vmatpush3.msra.mxu1 %v1068_v17  ;;  %v1093_v18 = vmul.f32 %v1092_v14, %v1068_v17  ;;  %v1081_v19 = vmul.f32 %v1080_v15, %v1068_v17  ;;  %v1098_v29 = vsel %vm178_vm0, %v1094_v26, 0.0  ;;  %v1086_v31 = vsel %vm178_vm0, %v1082_v27, 0.0 }
 0xa70   :  { %2218 = vmatprep.subr.mxu1 %v2536_v6  ;;  %v1173_v14 = vrot.slane %v2682_v10, %v1172_v5 }
 0xa71   :  { %v1095_v24 = vsel %vm178_vm0, %v1093_v18, 0.0  ;;  %v1083_v25 = vsel %vm178_vm0, %v1081_v19, 0.0 }
 0xa72   :  { %1096 = vadd.xlane.f32.xlu0 %v1095_v24  ;;  %1084 = vadd.xlane.f32.xlu1 %v1083_v25 }
 0xa76   :  { %1099 = vadd.xlane.f32.xlu0 %v1098_v29  ;;  %1087 = vadd.xlane.f32.xlu1 %v1086_v31 }
 0xafb   :  { %v1097_v35 = vpop.xlane.xlu0 %1096  ;;  %v1085_v37 = vpop.xlane.xlu1 %1084 }
 0xafc   :  { %v1108_v40 = vrot.slane %v1085_v37, %v1107_v34 }
 0xafe   :  { %v1133_v43 = vadd.f32 %v1108_v40, %v1097_v35 }
 0xaff   :  { %v1088_v44 = vpop.xlane.xlu1 %1087  ;;  %v1100_v47 = vpop.xlane.xlu0 %1099 }
 0xb00   :  { %v1112_v45 = vrot.slane %v1088_v44, %v1107_v34  ;;  %vm1135_vm1 = vcmp.gt.f32.partialorder %v1133_v43, 0.0  ;;  %v1137_v46 = vmul.f32 0.2, %v1133_v43  ;;  %v1361_v44 = vld [vmem:[#allocation10 + $0x10] sm:$0xff] }
 0xb02   :  { %v1134_v20 = vadd.f32 %v1112_v45, %v1100_v47  ;;  %v1139_v48 = vsel %vm1135_vm1, %v1133_v43, %v1137_v46  ;;  %v1362_v43 = vld [vmem:[#allocation10 + $0x18] sm:$0xff]  ;;  %v1360_v45 = vld [vmem:[#allocation10 + $0x8] sm:$0xff]  ;;  %v1359_v46 = vld [vmem:[#allocation10] sm:$0xff] }
 0xb03   :  { %v1145_v7 = vsel %vm1142_vm2, %v1139_v48, -1e+30  ;;  %2223 = vmatprep.subr.mxu0 %v1362_v43 }
 0xb04   :  { %v1148_v21 = vsel %vm1147_vm3, %v1145_v7, -inf  ;;  %vm1136_vm4 = vcmp.gt.f32.partialorder %v1134_v20, 0.0  ;;  %v1138_v49 = vmul.f32 0.2, %v1134_v20  ;;  %2224 = vmatpush3.msra.mxu0 %v1362_v43  ;;  %v1487_v43 = vrot.slane %v2790_v28, %v1172_v5 }
 0xb05   :  { %1149 = vmax.xlane.f32.xlu1 %v1148_v21  ;;  %2225 = vmatprep.subr.mxu0 %v1361_v44 }
 0xb06   :  { %v1140_v22 = vsel %vm1136_vm4, %v1134_v20, %v1138_v49  ;;  %2226 = vmatpush3.msra.mxu0 %v1361_v44 }
 0xb07   :  { %v1146_v50 = vsel %vm1142_vm2, %v1140_v22, -1e+30  ;;  %2227 = vmatprep.subr.mxu0 %v1360_v45  ;;  %v1349_v22 = vrot.slane %v2820_v11, %v2713_v13 }
 0xb08   :  { %v1151_v51 = vsel %vm1147_vm3, %v1146_v50, -inf  ;;  %2228 = vmatpush3.msra.mxu0 %v1360_v45 }
 0xb09   :  { %1152 = vmax.xlane.f32.xlu0 %v1151_v51  ;;  %2229 = vmatprep.subr.mxu0 %v1359_v46 }
 0xb0a   :  { %2230 = vmatpush3.msra.mxu0 %v1359_v46 }
 0xb8e   :  { %v1150_v52 = vpop.xlane.xlu1 %1149 }
 0xb8f   :  { %v1154_v54 = vsub.f32 %v1145_v7, %v1150_v52  ;;  %v1355_v52 = vrot.slane %v2820_v11, %v2718_v16 }
 0xb91   :  { %v1156_v56 = vmul.f32 1.442695, %v1154_v54 }
 0xb92   :  { %v1153_v57 = vpop.xlane.xlu0 %1152 }
 0xb93   :  { %2373 = vpow2.f32 %v1156_v56  ;;  %v1155_v30 = vsub.f32 %v1146_v50, %v1153_v57 }
 0xb95   :  { %v1158_v60 = vmul.f32 1.442695, %v1155_v30 }
 0xb97   :  { %2375 = vpow2.f32 %v1158_v60 }
 0xba0   :  { %v2374_v33 = vpop.eup %2373 }
 0xba1   :  { %v1160_v61 = vsel %vm1147_vm3, %v2374_v33, 0.0 }
 0xba2   :  { %1161 = vadd.xlane.f32.xlu1 %v1160_v61  ;;  %v1366_v61 = vrot.slane %v2790_v28, %v2745_v41 }
 0xba4   :  { %v2376_v62 = vpop.eup %2375 }
 0xba5   :  { %v1163_v36 = vsel %vm1147_vm3, %v2376_v62, 0.0 }
 0xba6   :  { %1164 = vadd.xlane.f32.xlu0 %v1163_v36 }
 0xc2b   :  { %v1162_v63 = vpop.xlane.xlu1 %1161 }
 0xc2c   :  { %2377 = vrcp.f32 %v1162_v63 }
 0xc2f   :  { %v1165_v0 = vpop.xlane.xlu0 %1164 }
 0xc30   :  { %2379 = vrcp.f32 %v1165_v0 }
 0xc39   :  { %v2378_v1 = vpop.eup %2377 }
 0xc3a   :  { %v1168_v2 = vmul.f32 %v2378_v1, %v2374_v33 }
 0xc3c   :  { %2216 = vmatmul.mubr.msk.f32.vlgmr.msra.gmra.mxu1 %vm1147_vm3, %v1168_v2 }
 0xc3d   :  { %v2380_v3 = vpop.eup %2379  ;;  %2219 = vmatpush3.msra.mxu1 %v2822_v12  ;;  %2220 = vmatprep.mubr.msk.f32.mxu1 %vm2537_vm5, %v2536_v6 }
 0xc3e   :  { %v1169_v4 = vmul.f32 %v2380_v3, %v2376_v62  ;;  %2234 = vmatprep.subr.mxu1 %v2536_v6 }
 0xc40   :  { %2221 = vmatmul.mubr.msk.f32.vlgmr.msra.gmra.mxu1 %vm1147_vm3, %v1169_v4 }
 0xc41   :  { %2238 = vmatprep.mubr.msk.f32.mxu1 %vm2537_vm5, %v2536_v6 }
 0xcfc   :  { %v1243_v15 = vpop.f32.mrf.mxu1 }
 0xcfd   :  { %v1244_v17 = vadd.f32 %v1243_v15, %v1173_v14 }
 0xcfe   :  { %v2217_v12 = vpop.f32.mrf.mxu1 }
 0xcff   :  { %v1320_v18 = vsel %vm178_vm0, %v1244_v17, 0.0 }
 0xd00   :  { %1321 = vadd.xlane.f32.xlu1 %v1320_v18  ;;  %v1316_v19 = vpop.f32.mrf.mxu1 }
 0xd01   :  { %v1317_v24 = vadd.f32 %v1316_v19, %v1173_v14 }
 0xd02   :  { %v2222_v25 = vpop.f32.mrf.mxu1 }
 0xd03   :  { %v1323_v26 = vsel %vm178_vm0, %v1317_v24, 0.0 }
 0xd04   :  { %1324 = vadd.xlane.f32.xlu0 %v1323_v26 }
 0xd89   :  { %v1322_v27 = vpop.xlane.xlu1 %1321 }
 0xd8a   :  { %v1326_v29 = vmul.f32 0.03125, %v1322_v27  ;;  %v1473_v27 = vrot.slane %v2790_v28, %v2758_v38 }
 0xd8c   :  { %v1328_v31 = vsub.f32 %v1244_v17, %v1326_v29 }
 0xd8d   :  { %v1325_v32 = vpop.xlane.xlu0 %1324 }
 0xd8e   :  { %v1327_v34 = vmul.f32 0.03125, %v1325_v32  ;;  %v1330_v35 = vmul.f32 %v1328_v31, %v1328_v31  ;;  %v1479_v32 = vrot.slane %v2790_v28, %v2761_v39 }
 0xd90   :  { %v1329_v37 = vsub.f32 %v1317_v24, %v1327_v34  ;;  %v1332_v10 = vsel %vm178_vm0, %v1330_v35, 0.0 }
 0xd91   :  { %1333 = vadd.xlane.f32.xlu1 %v1332_v10 }
 0xd92   :  { %v1331_v40 = vmul.f32 %v1329_v37, %v1329_v37 }
 0xd94   :  { %v1335_v42 = vsel %vm178_vm0, %v1331_v40, 0.0 }
 0xd95   :  { %1336 = vadd.xlane.f32.xlu0 %v1335_v42 }
 0xe1a   :  { %v1334_v47 = vpop.xlane.xlu1 %1333 }
 0xe1b   :  { %v1338_v20 = vmul.f32 0.03125, %v1334_v47 }
 0xe1d   :  { %v1340_v48 = vadd.f32 1e-05, %v1338_v20 }
 0xe1e   :  { %v1337_v7 = vpop.xlane.xlu0 %1336 }
 0xe1f   :  { %2381 = vrsqrt.f32 %v1340_v48  ;;  %v1339_v21 = vmul.f32 0.03125, %v1337_v7 }
 0xe21   :  { %v1341_v49 = vadd.f32 1e-05, %v1339_v21 }
 0xe23   :  { %2383 = vrsqrt.f32 %v1341_v49 }
 0xe2c   :  { %v2382_v50 = vpop.eup %2381 }
 0xe2d   :  { %v1344_v51 = vmul.f32 %v2382_v50, %v1328_v31 }
 0xe2f   :  { %v1350_v54 = vmul.f32 %v1349_v22, %v1344_v51 }
 0xe30   :  { %v2384_v56 = vpop.eup %2383 }
 0xe31   :  { %v1345_v57 = vmul.f32 %v2384_v56, %v1329_v37  ;;  %v2866_v30 = vadd.f32 %v1355_v52, %v1350_v54 }
 0xe33   :  { %v1351_v60 = vmul.f32 %v1349_v22, %v1345_v57  ;;  %2231 = vmatprep.mubr.msk.f32.mxu0 %vm178_vm0, %v2866_v30 }
 0xe35   :  { %v2870_v33 = vadd.f32 %v1355_v52, %v1351_v60 }
 0xe37   :  { %2232 = vmatmul.mubr.msk.f32.vlgmr.msra.gmra.mxu0 %vm178_vm0, %v2870_v33 }
 0xef7   :  { %v2233_v62 = vpop.f32.mrf.mxu0 }
 0xef8   :  { %v1445_v36 = vadd.f32 %v2233_v62, %v1366_v61  ;;  %v1358_v62 = vld [vmem:[%s3001_s4] sm:$0xff]  ;;  %s2538_s4 = smov 64  }
 0xef9   :  { %v1439_v11 = vpop.f32.mrf.mxu0 }
 0xefa   :  { %v1440_v63 = vadd.f32 %v1439_v11, %v1366_v61  ;;  %1450 = vadd.xlane.f32.xlu0 %v1445_v36 }
 0xefc   :  { %1448 = vadd.xlane.f32.xlu1 %v1440_v63 }
 0xf83   :  { %v1451_v0 = vpop.xlane.xlu0 %1450 }
 0xf84   :  { %v1453_v1 = vmul.f32 0.0078125, %v1451_v0  ;;  %v1697_v0 = vrot.slane %v2778_v58, 4 }
 0xf85   :  { %v1449_v2 = vpop.xlane.xlu1 %1448 }
 0xf86   :  { %v1455_v3 = vsub.f32 %v1445_v36, %v1453_v1  ;;  %v1452_v4 = vmul.f32 0.0078125, %v1449_v2  ;;  %v1709_v2 = vrot.slane %v2781_v59, 4 }
 0xf88   :  { %v1454_v14 = vsub.f32 %v1440_v63, %v1452_v4  ;;  %v1457_v15 = vmul.f32 %v1455_v3, %v1455_v3  ;;  %v1763_v4 = vld [vmem:[#allocation11 + $0xf8] sm:$0xff] }
 0xf89   :  { %2072 = vmatprep.subr.mxu0 %v1763_v4  ;;  %v1860_v4 = vld [vmem:[%s3010_s13 + $0x58] sm:$0xff] }
 0xf8a   :  { %1460 = vadd.xlane.f32.xlu0 %v1457_v15  ;;  %v1456_v17 = vmul.f32 %v1454_v14, %v1454_v14  ;;  %v1762_v15 = vld [vmem:[#allocation11 + $0xf0] sm:$0xff] }
 0xf8c   :  { %1458 = vadd.xlane.f32.xlu1 %v1456_v17  ;;  %v1746_v17 = vld [vmem:[#allocation11 + $0x70] sm:$0xff] }
0x1013   :  { %v1461_v12 = vpop.xlane.xlu0 %1460 }
0x1014   :  { %v1463_v18 = vmul.f32 0.0078125, %v1461_v12  ;;  %v1761_v12 = vld [vmem:[#allocation11 + $0xe8] sm:$0xff] }
0x1015   :  { %v1459_v19 = vpop.xlane.xlu1 %1458 }
0x1016   :  { %v1465_v24 = vadd.f32 1e-05, %v1463_v18  ;;  %v1462_v25 = vmul.f32 0.0078125, %v1459_v19  ;;  %v1745_v18 = vld [vmem:[#allocation11 + $0x68] sm:$0xff]  ;;  %v1760_v19 = vld [vmem:[#allocation11 + $0xe0] sm:$0xff] }
0x1018   :  { %2385 = vrsqrt.f32 %v1465_v24  ;;  %v1464_v26 = vadd.f32 1e-05, %v1462_v25  ;;  %v1744_v24 = vld [vmem:[#allocation11 + $0x60] sm:$0xff]  ;;  %v1759_v25 = vld [vmem:[#allocation11 + $0xd8] sm:$0xff] }
0x101a   :  { %2387 = vrsqrt.f32 %v1464_v26  ;;  %v1743_v26 = vld [vmem:[#allocation11 + $0x58] sm:$0xff] }
0x1025   :  { %v2386_v29 = vpop.eup %2385 }
0x1026   :  { %v1469_v31 = vmul.f32 %v2386_v29, %v1455_v3  ;;  %v2299_v3 = vpack.i.bf16 %v1697_v0, %v1709_v2  ;;  %v1742_v29 = vld [vmem:[#allocation11 + $0x50] sm:$0xff]  ;;  %v1861_v2 = vld [vmem:[%s3010_s13 + $0x60] sm:$0xff] }
0x1027   :  { %v2388_v34 = vpop.eup %2387 }
0x1028   :  { %v1475_v35 = vmul.f32 %v1473_v27, %v1469_v31  ;;  %v1468_v37 = vmul.f32 %v2388_v34, %v1454_v14  ;;  %v1747_v14 = vld [vmem:[#allocation11 + $0x78] sm:$0xff]  ;;  %v1757_v31 = vld [vmem:[#allocation11 + $0xc8] sm:$0xff]  ;;  %v1756_v34 = vld [vmem:[#allocation11 + $0xc0] sm:$0xff] }
0x1029   :  { %2073 = vmatpush3.msra.mxu0 %v1747_v14  ;;  %v1859_v14 = vld [vmem:[%s3010_s13 + $0x50] sm:$0xff] }
0x102a   :  { %v1474_v10 = vmul.f32 %v1473_v27, %v1468_v37  ;;  %v1481_v40 = vadd.f32 %v1479_v32, %v1475_v35  ;;  %2074 = vmatprep.subr.mxu0 %v1762_v15  ;;  %v1758_v27 = vld [vmem:[#allocation11 + $0xd0] sm:$0xff]  ;;  %v1740_v35 = vld [vmem:[#allocation11 + $0x40] sm:$0xff]  ;;  %v1755_v37 = vld [vmem:[#allocation11 + $0xb8] sm:$0xff] }
0x102b   :  { %2075 = vmatpush3.msra.mxu0 %v1746_v17  ;;  %v1858_v15 = vld [vmem:[%s3010_s13 + $0x48] sm:$0xff]  ;;  %v1857_v17 = vld [vmem:[%s3010_s13 + $0x40] sm:$0xff] }
0x102c   :  { %2389 = vtanh.f32 %v1481_v40  ;;  %v1480_v42 = vadd.f32 %v1479_v32, %v1474_v10  ;;  %2076 = vmatprep.subr.mxu0 %v1761_v12  ;;  %v1741_v32 = vld [vmem:[#allocation11 + $0x48] sm:$0xff]  ;;  %v1739_v10 = vld [vmem:[#allocation11 + $0x38] sm:$0xff]  ;;  %v1754_v40 = vld [vmem:[#allocation11 + $0xb0] sm:$0xff] }
0x102d   :  { %2077 = vmatpush3.msra.mxu0 %v1745_v18  ;;  %v1856_v12 = vld [vmem:[%s3010_s13 + $0x38] sm:$0xff] }
0x102e   :  { %2391 = vtanh.f32 %v1480_v42  ;;  %2078 = vmatprep.subr.mxu0 %v1760_v19  ;;  %v1738_v42 = vld [vmem:[#allocation11 + $0x30] sm:$0xff] }
0x102f   :  { %2079 = vmatpush3.msra.mxu0 %v1744_v24 }
0x1030   :  { %2080 = vmatprep.subr.mxu0 %v1759_v25 }
0x1031   :  { %2081 = vmatpush3.msra.mxu0 %v1743_v26 }
0x1032   :  { %2082 = vmatprep.subr.mxu0 %v1758_v27 }
0x1033   :  { %2083 = vmatpush3.msra.mxu0 %v1742_v29 }
0x1034   :  { %2084 = vmatprep.subr.mxu0 %v1757_v31 }
0x1035   :  { %2085 = vmatpush3.msra.mxu0 %v1741_v32 }
0x1036   :  { %2086 = vmatprep.subr.mxu0 %v1756_v34 }
0x1037   :  { %2087 = vmatpush3.msra.mxu0 %v1740_v35 }
0x1038   :  { %2088 = vmatprep.subr.mxu0 %v1755_v37 }
0x1039   :  { %v2390_v44 = vpop.eup %2389  ;;  %2089 = vmatpush3.msra.mxu0 %v1739_v10 }
0x103a   :  { %v1489_v45 = vmul.f32 %v2390_v44, %v1487_v43  ;;  %2090 = vmatprep.subr.mxu0 %v1754_v40  ;;  %v1737_v44 = vld [vmem:[#allocation11 + $0x28] sm:$0xff] }
0x103b   :  { %v2392_v46 = vpop.eup %2391  ;;  %2091 = vmatpush3.msra.mxu0 %v1738_v42 }
0x103c   :  { %1492 = vadd.xlane.f32.xlu0 %v1489_v45  ;;  %v1488_v47 = vmul.f32 %v2392_v46, %v1487_v43  ;;  %v1753_v43 = vld [vmem:[#allocation11 + $0xa8] sm:$0xff]  ;;  %v1752_v45 = vld [vmem:[#allocation11 + $0xa0] sm:$0xff] }
0x103d   :  { %2092 = vmatprep.subr.mxu0 %v1753_v43  ;;  %v1736_v46 = vld [vmem:[#allocation11 + $0x20] sm:$0xff] }
0x103e   :  { %1490 = vadd.xlane.f32.xlu1 %v1488_v47  ;;  %2093 = vmatpush3.msra.mxu0 %v1737_v44  ;;  %v1751_v47 = vld [vmem:[#allocation11 + $0x98] sm:$0xff] }
0x103f   :  { %2094 = vmatprep.subr.mxu0 %v1752_v45 }
0x1040   :  { %2095 = vmatpush3.msra.mxu0 %v1736_v46 }
0x1041   :  { %2096 = vmatprep.subr.mxu0 %v1751_v47 }
0x10c5   :  { %v1493_v20 = vpop.xlane.xlu0 %1492 }
0x10c7   :  { %v1491_v48 = vpop.xlane.xlu1 %1490 }
0x10c8   :  { %v1494_v7 = vmax.f32 %v1491_v48, %v1493_v20 }
0x10ca   :  { %v1495_v21 = vrot.slane %v1494_v7, 4 }
0x10cc   :  { %v1496_v49 = vmax.f32 %v1494_v7, %v1495_v21  ;;  %v1750_v21 = vld [vmem:[#allocation11 + $0x90] sm:$0xff] }
0x10ce   :  { %v1497_v22 = vrot.slane %v1496_v49, 2 }
0x10d0   :  { %v1498_v50 = vmax.f32 %v1496_v49, %v1497_v22  ;;  %v1734_v49 = vld [vmem:[#allocation11 + $0x10] sm:$0xff] }
0x10d2   :  { %v1499_v51 = vrot.slane %v1498_v50, 1 }
0x10d4   :  { %v1500_v52 = vmax.f32 %v1498_v50, %v1499_v51 }
0x10d6   :  { %v1501_v54 = vsub.f32 %v1491_v48, %v1500_v52  ;;  %v1502_v56 = vsub.f32 %v1493_v20, %v1500_v52  ;;  %v1735_v48 = vld [vmem:[#allocation11 + $0x18] sm:$0xff]  ;;  %v1749_v52 = vld [vmem:[#allocation11 + $0x88] sm:$0xff] }
0x10d7   :  { %2097 = vmatpush3.msra.mxu0 %v1735_v48 }
0x10d8   :  { %v1503_v8 = vmul.f32 1.442695, %v1501_v54  ;;  %v1505_v57 = vmul.f32 1.442695, %v1502_v56  ;;  %2098 = vmatprep.subr.mxu0 %v1750_v21  ;;  %v1665_v54 = vrot.slane %v2768_v53, 4  ;;  %v1733_v56 = vld [vmem:[#allocation11 + $0x8] sm:$0xff] }
0x10d9   :  { %2099 = vmatpush3.msra.mxu0 %v1734_v49 }
0x10da   :  { %2393 = vpow2.f32 %v1503_v8  ;;  %2100 = vmatprep.subr.mxu0 %v1749_v52  ;;  %v1748_v8 = vld [vmem:[#allocation11 + $0x80] sm:$0xff] }
0x10db   :  { %2395 = vpow2.f32 %v1505_v57  ;;  %2101 = vmatpush3.msra.mxu0 %v1733_v56 }
0x10dc   :  { %2102 = vmatprep.subr.mxu0 %v1748_v8 }
0x10e7   :  { %v2394_v28 = vpop.eup %2393 }
0x10e8   :  { %v2396_v5 = vpop.eup %2395  ;;  %v1507_v61 = vmul.f32 %v2394_v28, %v2866_v30 }
0x10e9   :  { %v1508_v60 = vmul.f32 %v2396_v5, %v2870_v33 }
0x10eb   :  { %2235 = vmatpush3.msra.mxu1 %v1508_v60 }
0x10ec   :  { %2236 = vmatprep.subr.mxu1 %v2536_v6 }
0x10ed   :  { %2237 = vmatpush3.msra.mxu1 %v1507_v61  ;;  %v1732_v61 = vld [vmem:[#allocation11] sm:$0xff] }
0x10ee   :  { %2239 = vmatmul.mubr.msk.f32.vlgmr.msra.gmra.mxu1 %vm1509_vm6, %v1358_v62  ;;  %2241 = vmatprep.subr.mxu1 %v2536_v6 }
0x10ef   :  { %2242 = vmatpush3.msra.mxu1 %v2396_v5  ;;  %2245 = vmatprep.mubr.msk.f32.mxu1 %vm2537_vm5, %v2536_v6 }
0x10f0   :  { %2243 = vmatprep.subr.mxu1 %v2536_v6  ;;  %2103 = vmatpush3.msra.mxu0 %v1732_v61  ;;  %v1849_v61 = vld [vmem:[%s3010_s13] sm:$0xff] }
0x10f1   :  { %2244 = vmatpush3.msra.mxu1 %v2394_v28 }
0x10f2   :  { %2246 = vmatmul.mubr.msk.f32.vlgmr.msra.gmra.mxu1 %vm1509_vm6, %v1358_v62  ;;  %2248 = vmatprep.subr.mxu1 %v2536_v6  ;;  %v1677_v62 = vrot.slane %v2771_v55, 4 }
0x10f3   :  { %2280 = vmatprep.mubr.msk.f32.mxu1 %vm2537_vm5, %v2536_v6 }
0x11ae   :  { %v2896_v30 = vpop.f32.mrf.mxu1 }
0x11b0   :  { %v2240_v33 = vpop.f32.mrf.mxu1 }
0x11b1   :  { %v1863_v33 = vld [vmem:[%s3010_s13 + $0x70] sm:$0xff] }
0x11b2   :  { %v1649_v36 = vpop.f32.mrf.mxu1 }
0x11b3   :  { %v1653_v11 = vmax.f32 %v1649_v36, 1e-20 }
0x11b4   :  { %v2247_v63 = vpop.f32.mrf.mxu1 }
0x11b5   :  { %2397 = vrcp.f32 %v1653_v11  ;;  %v2314_v11 = vpack.i.bf16 %v1665_v54, %v1677_v62  ;;  %v137_v62 = vld [vmem:[%s3004_s7] sm:$0x7f] }
0x11c2   :  { %v2398_v1 = vpop.eup %2397 }
0x11c3   :  { %1657 = vperm.xlu1 %2298, %v2398_v1   ;;  %v1862_v1 = vld [vmem:[%s3010_s13 + $0x68] sm:$0xff] }
0x11c7   :  { %2300 = vrot.lane.b32.xlu1 %v2299_v3, %s2538_s4 }
0x123e   :  { %v1658_v20 = vpop.permute.xlu1 %1657 }
0x123f   :  { %v1660_v7 = vmul.f32 %v1658_v20, %v2896_v30  ;;  %v1864_v30 = vld [vmem:[%s3010_s13 + $0x78] sm:$0xff] }
0x1240   :  { %2249 = vmatpush3.msra.mxu1 %v1864_v30 }
0x1241   :  { %v1693_v22 = vrot.slane %v1660_v7, 4  ;;  %v1705_v50 = vrot.slane %v1660_v7, 6  ;;  %v1673_v51 = vrot.slane %v1660_v7, 2  ;;  %v1701_v5 = vrot.slane %v1660_v7, 5  ;;  %2250 = vmatprep.subr.mxu1 %v2536_v6 }
0x1242   :  { %v1713_v60 = vrot.slane %v1660_v7, 7  ;;  %v1669_v63 = vrot.slane %v1660_v7, 1  ;;  %v1681_v0 = vrot.slane %v1660_v7, 3  ;;  %2251 = vmatpush3.msra.mxu1 %v1863_v33  ;;  %v2301_v18 = vpop.permute.xlu1 %2300  ;;  %v1767_v33 = vrot.slane %v137_v62, %v2677_v9 }
0x1243   :  { %v2304_v57 = vpack.i.bf16 %v1693_v22, %v1705_v50  ;;  %v2309_v28 = vpack.i.bf16 %v1660_v7, %v1673_v51  ;;  %2252 = vmatprep.subr.mxu1 %v2536_v6  ;;  %v2303_v31 = vunpack.i.h.bf16 %v2301_v18  ;;  %v2302_v32 = vunpack.i.l.bf16 %v2301_v18 }
0x1244   :  { %v2319_v36 = vpack.i.bf16 %v1701_v5, %v1713_v60  ;;  %v2324_v3 = vpack.i.bf16 %v1669_v63, %v1681_v0  ;;  %2253 = vmatpush3.msra.mxu1 %v1862_v1  ;;  %v1851_v5 = vld [vmem:[%s3010_s13 + $0x10] sm:$0xff]  ;;  %v1850_v60 = vld [vmem:[%s3010_s13 + $0x8] sm:$0xff]  ;;  %v1841_v63 = vrot.slane %v137_v62, %v2700_v23  ;;  %v1846_v1 = vrot.slane %v137_v62, %v2713_v13 }
0x1245   :  { %2305 = vrot.lane.b32.xlu0 %v2304_v57, %s2539_s29  ;;  %2310 = vrot.lane.b32.xlu1 %v2309_v28, %s2539_s29  ;;  %v1853_v57 = vld [vmem:[%s3010_s13 + $0x20] sm:$0xff]  ;;  %v1852_v28 = vld [vmem:[%s3010_s13 + $0x18] sm:$0xff]  ;;  %v1953_v23 = vrot.slane %v137_v62, %v2761_v39 }
0x1246   :  { %2254 = vmatprep.subr.mxu1 %v2536_v6 }
0x1247   :  { %2255 = vmatpush3.msra.mxu1 %v1861_v2 }
0x1248   :  { %2256 = vmatprep.subr.mxu1 %v2536_v6 }
0x1249   :  { %2320 = vrot.lane.b32.xlu0 %v2319_v36, %s2540_s19  ;;  %2315 = vrot.lane.b32.xlu1 %v2314_v11, %s2538_s4 }
0x124a   :  { %2257 = vmatpush3.msra.mxu1 %v1860_v4 }
0x124b   :  { %2258 = vmatprep.subr.mxu1 %v2536_v6 }
0x124c   :  { %2259 = vmatpush3.msra.mxu1 %v1859_v14  ;;  %v1942_v14 = vrot.slane %v137_v62, %v2745_v41 }
0x124d   :  { %2325 = vrot.lane.b32.xlu0 %v2324_v3, %s2540_s19  ;;  %2260 = vmatprep.subr.mxu1 %v2536_v6 }
0x124e   :  { %2261 = vmatpush3.msra.mxu1 %v1858_v15 }
0x124f   :  { %2262 = vmatprep.subr.mxu1 %v2536_v6 }
0x1250   :  { %2263 = vmatpush3.msra.mxu1 %v1857_v17 }
0x1251   :  { %2264 = vmatprep.subr.mxu1 %v2536_v6 }
0x1252   :  { %2265 = vmatpush3.msra.mxu1 %v1856_v12  ;;  %v1947_v12 = vrot.slane %v137_v62, %v2758_v38 }
0x1253   :  { %2266 = vmatprep.subr.mxu1 %v2536_v6 }
0x12b7   :  { %v2306_v19 = vpop.permute.xlu0 %2305  ;;  %v2311_v24 = vpop.permute.xlu1 %2310 }
0x12b8   :  { %v2308_v25 = vunpack.i.h.bf16 %v2306_v19  ;;  %v2307_v26 = vunpack.i.l.bf16 %v2306_v19  ;;  %v2313_v37 = vunpack.i.h.bf16 %v2311_v24  ;;  %v2312_v10 = vunpack.i.l.bf16 %v2311_v24 }
0x12ba   :  { %v1717_v27 = vsel %vm178_vm0, %v2778_v58, %v2308_v25  ;;  %v1720_v29 = vsel %vm178_vm0, %v2781_v59, %v2307_v26  ;;  %v1685_v20 = vsel %vm178_vm0, %v2768_v53, %v2313_v37  ;;  %v1690_v48 = vsel %vm178_vm0, %v2771_v55, %v2312_v10  ;;  %v1855_v53 = vld [vmem:[%s3010_s13 + $0x30] sm:$0xff]  ;;  %v1854_v55 = vld [vmem:[%s3010_s13 + $0x28] sm:$0xff]  ;;  %v2005_v26 = vld [vmem:[#allocation2] ss:$0 sm:$0xff] }
0x12bb   :  { %v2321_v34 = vpop.permute.xlu0 %2320  ;;  %v2316_v35 = vpop.permute.xlu1 %2315  ;;  %v1718_v43 = vsel %vm1686_vm7, %v1717_v27, %v2303_v31  ;;  %v1721_v44 = vsel %vm1686_vm7, %v1720_v29, %v2302_v32  ;;  %2267 = vmatpush3.msra.mxu1 %v1855_v53 }
0x12bc   :  { %v2323_v40 = vunpack.i.h.bf16 %v2321_v34  ;;  %v2322_v42 = vunpack.i.l.bf16 %v2321_v34  ;;  %v2318_v45 = vunpack.i.h.bf16 %v2316_v35  ;;  %v2317_v46 = vunpack.i.l.bf16 %v2316_v35  ;;  %2268 = vmatprep.subr.mxu1 %v2536_v6 }
0x12bd   :  { %2269 = vmatpush3.msra.mxu1 %v1854_v55 }
0x12be   :  { %v1719_v58 = vsel %vm1688_vm8, %v1718_v43, %v2323_v40  ;;  %v1722_v59 = vsel %vm1688_vm8, %v1721_v44, %v2322_v42  ;;  %v1687_v22 = vsel %vm1686_vm7, %v1685_v20, %v2318_v45  ;;  %v1691_v50 = vsel %vm1686_vm7, %v1690_v48, %v2317_v46  ;;  %2270 = vmatprep.subr.mxu1 %v2536_v6 }
0x12bf   :  { %v2326_v47 = vpop.permute.xlu0 %2325  ;;  %v1725_v49 = vrot.slane %v1719_v58, 7  ;;  %v1726_v51 = vrot.slane %v1722_v59, 7  ;;  %2271 = vmatpush3.msra.mxu1 %v1853_v57 }
0x12c0   :  { %v2328_v7 = vunpack.i.h.bf16 %v2326_v47  ;;  %v2327_v21 = vunpack.i.l.bf16 %v2326_v47  ;;  %2272 = vmatprep.subr.mxu1 %v2536_v6 }
0x12c1   :  { %2273 = vmatpush3.msra.mxu1 %v1852_v28 }
0x12c2   :  { %v1689_v52 = vsel %vm1688_vm8, %v1687_v22, %v2328_v7  ;;  %v1692_v54 = vsel %vm1688_vm8, %v1691_v50, %v2327_v21  ;;  %2274 = vmatprep.subr.mxu1 %v2536_v6 }
0x12c3   :  { %v1731_v56 = vsel %vm1729_vm9, %v1692_v54, %v1726_v51  ;;  %v1730_v8 = vsel %vm1729_vm9, %v1689_v52, %v1725_v49  ;;  %2275 = vmatpush3.msra.mxu1 %v1851_v5 }
0x12c4   :  { %1832 = vmatprep.mubr.f32.mxu0 %v1731_v56  ;;  %2276 = vmatprep.subr.mxu1 %v2536_v6 }
0x12c5   :  { %1833 = vmatmul.mubr.f32.vlgmr.msra.gmra.mxu0 %v1730_v8  ;;  %2277 = vmatpush3.msra.mxu1 %v1850_v60 }
0x12c6   :  { %2278 = vmatprep.subr.mxu1 %v2536_v6  ;;  %v1868_v6 = vrot.slane %v137_v62, %v2718_v16 }
0x12c7   :  { %2279 = vmatpush3.msra.mxu1 %v1849_v61 }
0x1385   :  { %v2104_v30 = vpop.f32.mrf.mxu0 }
0x1387   :  { %v2105_v36 = vpop.f32.mrf.mxu0 }
0x1388   :  { %v2106_v11 = vadd.f32 %v2105_v36, %v2104_v30 }
0x138a   :  { %v1835_v0 = vadd.f32 %v2106_v11, %v1767_v33 }
0x138c   :  { %v1842_v2 = vmul.f32 %v1841_v63, %v1835_v0 }
0x138e   :  { %v1847_v3 = vadd.f32 %v1846_v1, %v1842_v2 }
0x1390   :  { %v1848_v4 = vmax.f32 %v1847_v3, 0.0 }
0x1392   :  { %2281 = vmatmul.mubr.f32.vlgmr.msra.gmra.mxu1 %v1848_v4 }
0x1452   :  { %v1935_v15 = vpop.f32.mrf.mxu1 }
0x1453   :  { %v1936_v17 = vadd.f32 %v1935_v15, %v1868_v6 }
0x1454   :  { %v2282_v9 = vpop.f32.mrf.mxu1 }
0x1455   :  { %v1943_v18 = vmul.f32 %v1942_v14, %v1936_v17 }
0x1457   :  { %v1948_v19 = vadd.f32 %v1947_v12, %v1943_v18 }
0x1459   :  { %v1949_v24 = vmax.f32 %v1948_v19, 0.0 }
0x145b   :  { %v1954_v13 = vmul.f32 %v1953_v23, %v1949_v24 }
0x145d   :  { %v1956_v25 = vsel %vm1955_vm10, %v1954_v13, 0.0 }
0x145e   :  { %1957 = vadd.xlane.f32.xlu1 %v1956_v25 }
0x14e7   :  { %v1958_v27 = vpop.xlane.xlu1 %1957 }
0x14e8   :  { %v1966_v16 = vadd.f32 %v2005_v26, %v1958_v27 }
0x14ea   :  { %1968 = vst.msk [vmem:[%s3012_s15] sm:$0x3] %vm1967_vm11, %v1966_v16 }
0x14eb   :  { %1973 = vsyncpa [#allocation4], 1 }
0x14ec   :  { %1974 = vsyncpa [#allocation6], 1 }
0x14ed   :  { %1975 = vsyncpa [#allocation9], 1 }
0x14ee   :  { %1976 = vsyncpa [#allocation12], 1 }

</bundles_post_ra>
